<compile_context>
chip_gen: v7x
topology: tpu7x:2x2x1
jax: 0.10.0
libtpu: 0.0.40
codegen_flags: <defaults>
</compile_context>

<pallas_src>
import functools
import math

import jax
import jax.numpy as jnp
from jax import lax
from jax.experimental import pallas as pl
from jax.experimental.pallas import tpu as pltpu


# ----------------------------- fused kernel -----------------------------

def _decoder_layer_kernel(
    x_ref, enc_ref,
    sa_wqkv_ref, sa_bqkv_ref, sa_wo_ref, sa_bo_ref, ln1_g_ref, ln1_b_ref,
    ca_wq_ref, ca_bq_ref, ca_wkv_ref, ca_bkv_ref, ca_wo_ref, ca_bo_ref,
    ln2_g_ref, ln2_b_ref,
    w1_ref, b1_ref, w2_ref, b2_ref, ln3_g_ref, ln3_b_ref,
    out_ref,
    *, batch, seq_len, num_heads, d_model,
):
    dk = d_model // num_heads

    x = x_ref[...]          # [B*S, D] f32 (kept f32: feeds the residual adds)
    enc_bf = enc_ref[...]   # [B*S, D] bf16 (matmul operand only)

    def layer_norm(h, g_ref, b_ref):
        mean = jnp.mean(h, axis=-1, keepdims=True)
        cen = h - mean
        var = jnp.mean(cen * cen, axis=-1, keepdims=True)
        return cen * lax.rsqrt(var + 1e-5) * g_ref[...] + b_ref[...]

    def attention(q, k, v, wo_ref, bo_ref):
        # q already carries the 1/sqrt(dk) scale (folded into Wq / bq in the
        # wrapper).  Cast once per block, then slice per (batch, head) only
        # for the small [S, S] score / PV matmuls.
        q_bf = q.astype(jnp.bfloat16)
        k_bf = k.astype(jnp.bfloat16)
        v_bf = v.astype(jnp.bfloat16)
        ctx_rows = []
        for b in range(batch):
            r0 = b * seq_len
            qb = q_bf[r0:r0 + seq_len]          # [S, D]
            kb = k_bf[r0:r0 + seq_len]
            vb = v_bf[r0:r0 + seq_len]
            heads = []
            for h in range(num_heads):
                c0 = h * dk
                # scores: contract the dk axis of q and k (no transpose)
                s = lax.dot_general(qb[:, c0:c0 + dk], kb[:, c0:c0 + dk],
                                    (((1,), (1,)), ((), ())),
                                    preferred_element_type=jnp.float32)  # [S,S]
                s = s - jnp.max(s, axis=-1, keepdims=True)
                p = jnp.exp(s)
                p = p * pl.reciprocal(jnp.sum(p, axis=-1, keepdims=True),
                                      approx=True)
                heads.append(jnp.dot(p.astype(jnp.bfloat16),
                                     vb[:, c0:c0 + dk],
                                     preferred_element_type=jnp.float32))
            ctx_rows.append(jnp.concatenate(heads, axis=-1))   # [S, D]
        ctx = jnp.concatenate(ctx_rows, axis=0)                # [B*S, D]
        # single full-K output projection (concat(heads) @ Wo + bo)
        return jnp.dot(ctx.astype(jnp.bfloat16), wo_ref[...],
                       preferred_element_type=jnp.float32) + bo_ref[...]

    # ---- self attention (fused QKV projection) + residual + LN1 ----
    qkv = jnp.dot(x.astype(jnp.bfloat16), sa_wqkv_ref[...],
                  preferred_element_type=jnp.float32) + sa_bqkv_ref[...]  # [B*S, 3D]
    sa = attention(qkv[:, 0:d_model],
                   qkv[:, d_model:2 * d_model],
                   qkv[:, 2 * d_model:3 * d_model],
                   sa_wo_ref, sa_bo_ref)
    x1 = layer_norm(x + sa, ln1_g_ref, ln1_b_ref)

    # ---- encoder-decoder attention (fused KV projection) + residual + LN2 ----
    q2 = jnp.dot(x1.astype(jnp.bfloat16), ca_wq_ref[...],
                 preferred_element_type=jnp.float32) + ca_bq_ref[...]     # [B*S, D]
    kv2 = jnp.dot(enc_bf, ca_wkv_ref[...],
                  preferred_element_type=jnp.float32) + ca_bkv_ref[...]   # [B*S, 2D]
    ca = attention(q2,
                   kv2[:, 0:d_model],
                   kv2[:, d_model:2 * d_model],
                   ca_wo_ref, ca_bo_ref)
    x2 = layer_norm(x1 + ca, ln2_g_ref, ln2_b_ref)

    # ---- position-wise FFN + residual + LN3 ----
    h1 = jnp.dot(x2.astype(jnp.bfloat16), w1_ref[...],
                 preferred_element_type=jnp.float32) + b1_ref[...]        # [B*S, d_ff]
    h1 = jnp.maximum(h1, 0.0)
    f = jnp.dot(h1.astype(jnp.bfloat16), w2_ref[...],
                preferred_element_type=jnp.float32) + b2_ref[...]         # [B*S, D]
    x3 = layer_norm(x2 + f, ln3_g_ref, ln3_b_ref)

    out_ref[...] = x3.astype(out_ref.dtype)


# ----------------------------- wrapper -----------------------------

def decoder_layer(x, enc_output, params, *, num_heads):
    B, S, D = x.shape
    dk = D // num_heads
    scale = 1.0 / math.sqrt(dk)
    d_ff = params["ffn_w1"].shape[1]

    sa = params["self_attn"]
    ca = params["enc_dec_attn"]

    # ---- one-time weight prep outside the kernel ----
    # Fuse Q/K/V (and cross K/V), fold the 1/sqrt(dk) scale into the Q weight
    # and bias, pre-cast matmul weights to bf16.
    sa_wqkv = jnp.concatenate(
        [sa["wq"] * scale, sa["wk"], sa["wv"]], axis=1).astype(jnp.bfloat16)
    sa_bqkv = jnp.concatenate(
        [sa["bq"] * scale, sa["bk"], sa["bv"]]).reshape(1, 3 * D).astype(jnp.float32)
    sa_wo = sa["wo"].astype(jnp.bfloat16)
    sa_bo = sa["bo"].reshape(1, D).astype(jnp.float32)

    ca_wq = (ca["wq"] * scale).astype(jnp.bfloat16)
    ca_bq = (ca["bq"] * scale).reshape(1, D).astype(jnp.float32)
    ca_wkv = jnp.concatenate([ca["wk"], ca["wv"]], axis=1).astype(jnp.bfloat16)
    ca_bkv = jnp.concatenate([ca["bk"], ca["bv"]]).reshape(1, 2 * D).astype(jnp.float32)
    ca_wo = ca["wo"].astype(jnp.bfloat16)
    ca_bo = ca["bo"].reshape(1, D).astype(jnp.float32)

    w1 = params["ffn_w1"].astype(jnp.bfloat16)
    b1 = params["ffn_b1"].reshape(1, d_ff).astype(jnp.float32)
    w2 = params["ffn_w2"].astype(jnp.bfloat16)
    b2 = params["ffn_b2"].reshape(1, D).astype(jnp.float32)

    # Flatten batch*seq into the matmul M dimension; enc is matmul-only -> bf16.
    x2d = x.reshape(B * S, D)
    enc2d = enc_output.reshape(B * S, D).astype(jnp.bfloat16)

    args = (
        x2d, enc2d,
        sa_wqkv, sa_bqkv, sa_wo, sa_bo,
        params["ln1_g"].reshape(1, D), params["ln1_b"].reshape(1, D),
        ca_wq, ca_bq, ca_wkv, ca_bkv, ca_wo, ca_bo,
        params["ln2_g"].reshape(1, D), params["ln2_b"].reshape(1, D),
        w1, b1, w2, b2,
        params["ln3_g"].reshape(1, D), params["ln3_b"].reshape(1, D),
    )

    # rough advisory cost for XLA's scheduler
    flops = (
        2 * B * S * D * 3 * D          # fused QKV projection
        + 4 * B * S * S * D            # self-attn scores + PV
        + 2 * B * S * D * D            # self-attn output projection
        + 2 * B * S * D * D            # cross-attn Q projection
        + 2 * B * S * D * 2 * D        # cross-attn fused KV projection
        + 4 * B * S * S * D            # cross-attn scores + PV
        + 2 * B * S * D * D            # cross-attn output projection
        + 4 * B * S * D * d_ff         # FFN (two matmuls)
    )
    transcendentals = B * (2 * num_heads * S * S + 2 * num_heads * S + 3 * S)
    bytes_accessed = (sum(int(a.size) * a.dtype.itemsize for a in args)
                      + B * S * D * 4)

    kernel = functools.partial(_decoder_layer_kernel,
                               batch=B, seq_len=S,
                               num_heads=num_heads, d_model=D)

    out = pl.pallas_call(
        kernel,
        out_shape=jax.ShapeDtypeStruct((B * S, D), jnp.float32),
        cost_estimate=pl.CostEstimate(
            flops=int(flops),
            transcendentals=int(transcendentals),
            bytes_accessed=int(bytes_accessed)),
    )(*args)

    return out.reshape(B, S, D)


# ----------------------------- parameter init -----------------------------

def init_params(key, d_model, num_heads, d_ff):
    ks = jax.random.split(key, 12)

    def w(k, shape):
        return jax.random.normal(k, shape, jnp.float32) * 0.02

    def mha_params(keys):
        return {
            "wq": w(keys[0], (d_model, d_model)), "bq": jnp.zeros((d_model,), jnp.float32),
            "wk": w(keys[1], (d_model, d_model)), "bk": jnp.zeros((d_model,), jnp.float32),
            "wv": w(keys[2], (d_model, d_model)), "bv": jnp.zeros((d_model,), jnp.float32),
            "wo": w(keys[3], (d_model, d_model)), "bo": jnp.zeros((d_model,), jnp.float32),
        }

    return {
        "self_attn": mha_params(ks[0:4]),
        "enc_dec_attn": mha_params(ks[4:8]),
        "ffn_w1": w(ks[8], (d_model, d_ff)), "ffn_b1": jnp.zeros((d_ff,), jnp.float32),
        "ffn_w2": w(ks[9], (d_ff, d_model)), "ffn_b2": jnp.zeros((d_model,), jnp.float32),
        "ln1_g": jnp.ones((d_model,), jnp.float32), "ln1_b": jnp.zeros((d_model,), jnp.float32),
        "ln2_g": jnp.ones((d_model,), jnp.float32), "ln2_b": jnp.zeros((d_model,), jnp.float32),
        "ln3_g": jnp.ones((d_model,), jnp.float32), "ln3_b": jnp.zeros((d_model,), jnp.float32),
    }


# ----------------------------- main -----------------------------

if __name__ == "__main__":
    batch, seq, d_model, num_heads, d_ff = 2, 8, 32, 4, 64

    key = jax.random.PRNGKey(0)
    k_x, k_enc, k_p = jax.random.split(key, 3)
    x = jax.random.normal(k_x, (batch, seq, d_model), jnp.float32)
    enc_output = jax.random.normal(k_enc, (batch, seq, d_model), jnp.float32)
    params = init_params(k_p, d_model, num_heads, d_ff)

    layer = jax.jit(functools.partial(decoder_layer, num_heads=num_heads))
    out = layer(x, enc_output, params)
    out = jax.block_until_ready(out)

    assert out.shape == (batch, seq, d_model) and out.dtype == jnp.float32
    assert bool(jnp.all(jnp.isfinite(out)))
    print("KERNEL_OK")
</pallas_src>

<mosaic_0001>
module attributes {stable_mosaic.version = 11 : i64} {
  func.func @_decoder_layer_kernel(%arg0: memref<16x32xf32, #tpu.memory_space<vmem>>, %arg1: memref<16x32xbf16, #tpu.memory_space<vmem>>, %arg2: memref<32x96xbf16, #tpu.memory_space<vmem>>, %arg3: memref<1x96xf32, #tpu.memory_space<vmem>>, %arg4: memref<32x32xbf16, #tpu.memory_space<vmem>>, %arg5: memref<1x32xf32, #tpu.memory_space<vmem>>, %arg6: memref<1x32xf32, #tpu.memory_space<vmem>>, %arg7: memref<1x32xf32, #tpu.memory_space<vmem>>, %arg8: memref<32x32xbf16, #tpu.memory_space<vmem>>, %arg9: memref<1x32xf32, #tpu.memory_space<vmem>>, %arg10: memref<32x64xbf16, #tpu.memory_space<vmem>>, %arg11: memref<1x64xf32, #tpu.memory_space<vmem>>, %arg12: memref<32x32xbf16, #tpu.memory_space<vmem>>, %arg13: memref<1x32xf32, #tpu.memory_space<vmem>>, %arg14: memref<1x32xf32, #tpu.memory_space<vmem>>, %arg15: memref<1x32xf32, #tpu.memory_space<vmem>>, %arg16: memref<32x64xbf16, #tpu.memory_space<vmem>>, %arg17: memref<1x64xf32, #tpu.memory_space<vmem>>, %arg18: memref<64x32xbf16, #tpu.memory_space<vmem>>, %arg19: memref<1x32xf32, #tpu.memory_space<vmem>>, %arg20: memref<1x32xf32, #tpu.memory_space<vmem>>, %arg21: memref<1x32xf32, #tpu.memory_space<vmem>>, %arg22: memref<16x32xf32, #tpu.memory_space<vmem>>) attributes {dimension_semantics = [], scalar_prefetch = 0 : i64, scratch_operands = 0 : i64, tpu.core_type = #tpu.core_type<tc>} {
    %c0 = arith.constant 0 : index
    %c0_0 = arith.constant 0 : index
    %0 = vector.load %arg0[%c0, %c0_0] : memref<16x32xf32, #tpu.memory_space<vmem>>, vector<16x32xf32>
    %c0_1 = arith.constant 0 : index
    %c0_2 = arith.constant 0 : index
    %1 = vector.load %arg1[%c0_1, %c0_2] : memref<16x32xbf16, #tpu.memory_space<vmem>>, vector<16x32xbf16>
    %2 = arith.truncf %0 : vector<16x32xf32> to vector<16x32xbf16>
    %c0_3 = arith.constant 0 : index
    %c0_4 = arith.constant 0 : index
    %3 = vector.load %arg2[%c0_3, %c0_4] : memref<32x96xbf16, #tpu.memory_space<vmem>>, vector<32x96xbf16>
    %cst = arith.constant dense<0.000000e+00> : vector<16x96xf32>
    %4 = tpu.matmul %2, %3, %cst {dimension_numbers = #tpu.dot_dimension_numbers<[1], [0], [0], [1], [0, 0, 1, 1], [], []>} : vector<16x32xbf16>, vector<32x96xbf16>, vector<16x96xf32> -> vector<16x96xf32>
    %c0_5 = arith.constant 0 : index
    %c0_6 = arith.constant 0 : index
    %5 = vector.load %arg3[%c0_5, %c0_6] : memref<1x96xf32, #tpu.memory_space<vmem>>, vector<1x96xf32>
    %6 = vector.broadcast %5 : vector<1x96xf32> to vector<16x96xf32>
    %7 = arith.addf %4, %6 : vector<16x96xf32>
    %8 = vector.extract_strided_slice %7 {offsets = [0, 0], sizes = [16, 32], strides = [1, 1]} : vector<16x96xf32> to vector<16x32xf32>
    %9 = vector.extract_strided_slice %7 {offsets = [0, 32], sizes = [16, 32], strides = [1, 1]} : vector<16x96xf32> to vector<16x32xf32>
    %10 = vector.extract_strided_slice %7 {offsets = [0, 64], sizes = [16, 32], strides = [1, 1]} : vector<16x96xf32> to vector<16x32xf32>
    %11 = arith.truncf %8 : vector<16x32xf32> to vector<16x32xbf16>
    %12 = arith.truncf %9 : vector<16x32xf32> to vector<16x32xbf16>
    %13 = arith.truncf %10 : vector<16x32xf32> to vector<16x32xbf16>
    %14 = vector.extract_strided_slice %11 {offsets = [0, 0], sizes = [8, 32], strides = [1, 1]} : vector<16x32xbf16> to vector<8x32xbf16>
    %15 = vector.extract_strided_slice %12 {offsets = [0, 0], sizes = [8, 32], strides = [1, 1]} : vector<16x32xbf16> to vector<8x32xbf16>
    %16 = vector.extract_strided_slice %13 {offsets = [0, 0], sizes = [8, 32], strides = [1, 1]} : vector<16x32xbf16> to vector<8x32xbf16>
    %17 = vector.extract_strided_slice %14 {offsets = [0, 0], sizes = [8, 8], strides = [1, 1]} : vector<8x32xbf16> to vector<8x8xbf16>
    %18 = vector.extract_strided_slice %15 {offsets = [0, 0], sizes = [8, 8], strides = [1, 1]} : vector<8x32xbf16> to vector<8x8xbf16>
    %cst_7 = arith.constant dense<0.000000e+00> : vector<8x8xf32>
    %19 = tpu.matmul %17, %18, %cst_7 {dimension_numbers = #tpu.dot_dimension_numbers<[1], [1], [0], [0], [0, 0, 1, 0], [], []>} : vector<8x8xbf16>, vector<8x8xbf16>, vector<8x8xf32> -> vector<8x8xf32>
    %cst_8 = arith.constant dense<0xFF800000> : vector<8xf32>
    %20 = vector.multi_reduction <maximumf>, %19, %cst_8 [1] : vector<8x8xf32> to vector<8xf32>
    %21 = vector.shape_cast %20 : vector<8xf32> to vector<8x1xf32>
    %22 = vector.broadcast %21 : vector<8x1xf32> to vector<8x8xf32>
    %23 = arith.subf %19, %22 : vector<8x8xf32>
    %24 = math.exp %23 : vector<8x8xf32>
    %cst_9 = arith.constant dense<0.000000e+00> : vector<8xf32>
    %25 = vector.multi_reduction <add>, %24, %cst_9 [1] : vector<8x8xf32> to vector<8xf32>
    %26 = vector.shape_cast %25 : vector<8xf32> to vector<8x1xf32>
    %27 = tpu.reciprocal %26 {approx = true} : vector<8x1xf32> -> vector<8x1xf32>
    %28 = vector.broadcast %27 : vector<8x1xf32> to vector<8x8xf32>
    %29 = arith.mulf %24, %28 : vector<8x8xf32>
    %30 = arith.truncf %29 : vector<8x8xf32> to vector<8x8xbf16>
    %31 = vector.extract_strided_slice %16 {offsets = [0, 0], sizes = [8, 8], strides = [1, 1]} : vector<8x32xbf16> to vector<8x8xbf16>
    %cst_10 = arith.constant dense<0.000000e+00> : vector<8x8xf32>
    %32 = tpu.matmul %30, %31, %cst_10 {dimension_numbers = #tpu.dot_dimension_numbers<[1], [0], [0], [1], [0, 0, 1, 1], [], []>} : vector<8x8xbf16>, vector<8x8xbf16>, vector<8x8xf32> -> vector<8x8xf32>
    %33 = vector.extract_strided_slice %14 {offsets = [0, 8], sizes = [8, 8], strides = [1, 1]} : vector<8x32xbf16> to vector<8x8xbf16>
    %34 = vector.extract_strided_slice %15 {offsets = [0, 8], sizes = [8, 8], strides = [1, 1]} : vector<8x32xbf16> to vector<8x8xbf16>
    %cst_11 = arith.constant dense<0.000000e+00> : vector<8x8xf32>
    %35 = tpu.matmul %33, %34, %cst_11 {dimension_numbers = #tpu.dot_dimension_numbers<[1], [1], [0], [0], [0, 0, 1, 0], [], []>} : vector<8x8xbf16>, vector<8x8xbf16>, vector<8x8xf32> -> vector<8x8xf32>
    %cst_12 = arith.constant dense<0xFF800000> : vector<8xf32>
    %36 = vector.multi_reduction <maximumf>, %35, %cst_12 [1] : vector<8x8xf32> to vector<8xf32>
    %37 = vector.shape_cast %36 : vector<8xf32> to vector<8x1xf32>
    %38 = vector.broadcast %37 : vector<8x1xf32> to vector<8x8xf32>
    %39 = arith.subf %35, %38 : vector<8x8xf32>
    %40 = math.exp %39 : vector<8x8xf32>
    %cst_13 = arith.constant dense<0.000000e+00> : vector<8xf32>
    %41 = vector.multi_reduction <add>, %40, %cst_13 [1] : vector<8x8xf32> to vector<8xf32>
    %42 = vector.shape_cast %41 : vector<8xf32> to vector<8x1xf32>
    %43 = tpu.reciprocal %42 {approx = true} : vector<8x1xf32> -> vector<8x1xf32>
    %44 = vector.broadcast %43 : vector<8x1xf32> to vector<8x8xf32>
    %45 = arith.mulf %40, %44 : vector<8x8xf32>
    %46 = arith.truncf %45 : vector<8x8xf32> to vector<8x8xbf16>
    %47 = vector.extract_strided_slice %16 {offsets = [0, 8], sizes = [8, 8], strides = [1, 1]} : vector<8x32xbf16> to vector<8x8xbf16>
    %cst_14 = arith.constant dense<0.000000e+00> : vector<8x8xf32>
    %48 = tpu.matmul %46, %47, %cst_14 {dimension_numbers = #tpu.dot_dimension_numbers<[1], [0], [0], [1], [0, 0, 1, 1], [], []>} : vector<8x8xbf16>, vector<8x8xbf16>, vector<8x8xf32> -> vector<8x8xf32>
    %49 = vector.extract_strided_slice %14 {offsets = [0, 16], sizes = [8, 8], strides = [1, 1]} : vector<8x32xbf16> to vector<8x8xbf16>
    %50 = vector.extract_strided_slice %15 {offsets = [0, 16], sizes = [8, 8], strides = [1, 1]} : vector<8x32xbf16> to vector<8x8xbf16>
    %cst_15 = arith.constant dense<0.000000e+00> : vector<8x8xf32>
    %51 = tpu.matmul %49, %50, %cst_15 {dimension_numbers = #tpu.dot_dimension_numbers<[1], [1], [0], [0], [0, 0, 1, 0], [], []>} : vector<8x8xbf16>, vector<8x8xbf16>, vector<8x8xf32> -> vector<8x8xf32>
    %cst_16 = arith.constant dense<0xFF800000> : vector<8xf32>
    %52 = vector.multi_reduction <maximumf>, %51, %cst_16 [1] : vector<8x8xf32> to vector<8xf32>
    %53 = vector.shape_cast %52 : vector<8xf32> to vector<8x1xf32>
    %54 = vector.broadcast %53 : vector<8x1xf32> to vector<8x8xf32>
    %55 = arith.subf %51, %54 : vector<8x8xf32>
    %56 = math.exp %55 : vector<8x8xf32>
    %cst_17 = arith.constant dense<0.000000e+00> : vector<8xf32>
    %57 = vector.multi_reduction <add>, %56, %cst_17 [1] : vector<8x8xf32> to vector<8xf32>
    %58 = vector.shape_cast %57 : vector<8xf32> to vector<8x1xf32>
    %59 = tpu.reciprocal %58 {approx = true} : vector<8x1xf32> -> vector<8x1xf32>
    %60 = vector.broadcast %59 : vector<8x1xf32> to vector<8x8xf32>
    %61 = arith.mulf %56, %60 : vector<8x8xf32>
    %62 = arith.truncf %61 : vector<8x8xf32> to vector<8x8xbf16>
    %63 = vector.extract_strided_slice %16 {offsets = [0, 16], sizes = [8, 8], strides = [1, 1]} : vector<8x32xbf16> to vector<8x8xbf16>
    %cst_18 = arith.constant dense<0.000000e+00> : vector<8x8xf32>
    %64 = tpu.matmul %62, %63, %cst_18 {dimension_numbers = #tpu.dot_dimension_numbers<[1], [0], [0], [1], [0, 0, 1, 1], [], []>} : vector<8x8xbf16>, vector<8x8xbf16>, vector<8x8xf32> -> vector<8x8xf32>
    %65 = vector.extract_strided_slice %14 {offsets = [0, 24], sizes = [8, 8], strides = [1, 1]} : vector<8x32xbf16> to vector<8x8xbf16>
    %66 = vector.extract_strided_slice %15 {offsets = [0, 24], sizes = [8, 8], strides = [1, 1]} : vector<8x32xbf16> to vector<8x8xbf16>
    %cst_19 = arith.constant dense<0.000000e+00> : vector<8x8xf32>
    %67 = tpu.matmul %65, %66, %cst_19 {dimension_numbers = #tpu.dot_dimension_numbers<[1], [1], [0], [0], [0, 0, 1, 0], [], []>} : vector<8x8xbf16>, vector<8x8xbf16>, vector<8x8xf32> -> vector<8x8xf32>
    %cst_20 = arith.constant dense<0xFF800000> : vector<8xf32>
    %68 = vector.multi_reduction <maximumf>, %67, %cst_20 [1] : vector<8x8xf32> to vector<8xf32>
    %69 = vector.shape_cast %68 : vector<8xf32> to vector<8x1xf32>
    %70 = vector.broadcast %69 : vector<8x1xf32> to vector<8x8xf32>
    %71 = arith.subf %67, %70 : vector<8x8xf32>
    %72 = math.exp %71 : vector<8x8xf32>
    %cst_21 = arith.constant dense<0.000000e+00> : vector<8xf32>
    %73 = vector.multi_reduction <add>, %72, %cst_21 [1] : vector<8x8xf32> to vector<8xf32>
    %74 = vector.shape_cast %73 : vector<8xf32> to vector<8x1xf32>
    %75 = tpu.reciprocal %74 {approx = true} : vector<8x1xf32> -> vector<8x1xf32>
    %76 = vector.broadcast %75 : vector<8x1xf32> to vector<8x8xf32>
    %77 = arith.mulf %72, %76 : vector<8x8xf32>
    %78 = arith.truncf %77 : vector<8x8xf32> to vector<8x8xbf16>
    %79 = vector.extract_strided_slice %16 {offsets = [0, 24], sizes = [8, 8], strides = [1, 1]} : vector<8x32xbf16> to vector<8x8xbf16>
    %cst_22 = arith.constant dense<0.000000e+00> : vector<8x8xf32>
    %80 = tpu.matmul %78, %79, %cst_22 {dimension_numbers = #tpu.dot_dimension_numbers<[1], [0], [0], [1], [0, 0, 1, 1], [], []>} : vector<8x8xbf16>, vector<8x8xbf16>, vector<8x8xf32> -> vector<8x8xf32>
    %81 = tpu.concatenate %32, %48, %64, %80 in 1 : vector<8x8xf32>, vector<8x8xf32>, vector<8x8xf32>, vector<8x8xf32> -> vector<8x32xf32>
    %82 = vector.extract_strided_slice %11 {offsets = [8, 0], sizes = [8, 32], strides = [1, 1]} : vector<16x32xbf16> to vector<8x32xbf16>
    %83 = vector.extract_strided_slice %12 {offsets = [8, 0], sizes = [8, 32], strides = [1, 1]} : vector<16x32xbf16> to vector<8x32xbf16>
    %84 = vector.extract_strided_slice %13 {offsets = [8, 0], sizes = [8, 32], strides = [1, 1]} : vector<16x32xbf16> to vector<8x32xbf16>
    %85 = vector.extract_strided_slice %82 {offsets = [0, 0], sizes = [8, 8], strides = [1, 1]} : vector<8x32xbf16> to vector<8x8xbf16>
    %86 = vector.extract_strided_slice %83 {offsets = [0, 0], sizes = [8, 8], strides = [1, 1]} : vector<8x32xbf16> to vector<8x8xbf16>
    %cst_23 = arith.constant dense<0.000000e+00> : vector<8x8xf32>
    %87 = tpu.matmul %85, %86, %cst_23 {dimension_numbers = #tpu.dot_dimension_numbers<[1], [1], [0], [0], [0, 0, 1, 0], [], []>} : vector<8x8xbf16>, vector<8x8xbf16>, vector<8x8xf32> -> vector<8x8xf32>
    %cst_24 = arith.constant dense<0xFF800000> : vector<8xf32>
    %88 = vector.multi_reduction <maximumf>, %87, %cst_24 [1] : vector<8x8xf32> to vector<8xf32>
    %89 = vector.shape_cast %88 : vector<8xf32> to vector<8x1xf32>
    %90 = vector.broadcast %89 : vector<8x1xf32> to vector<8x8xf32>
    %91 = arith.subf %87, %90 : vector<8x8xf32>
    %92 = math.exp %91 : vector<8x8xf32>
    %cst_25 = arith.constant dense<0.000000e+00> : vector<8xf32>
    %93 = vector.multi_reduction <add>, %92, %cst_25 [1] : vector<8x8xf32> to vector<8xf32>
    %94 = vector.shape_cast %93 : vector<8xf32> to vector<8x1xf32>
    %95 = tpu.reciprocal %94 {approx = true} : vector<8x1xf32> -> vector<8x1xf32>
    %96 = vector.broadcast %95 : vector<8x1xf32> to vector<8x8xf32>
    %97 = arith.mulf %92, %96 : vector<8x8xf32>
    %98 = arith.truncf %97 : vector<8x8xf32> to vector<8x8xbf16>
    %99 = vector.extract_strided_slice %84 {offsets = [0, 0], sizes = [8, 8], strides = [1, 1]} : vector<8x32xbf16> to vector<8x8xbf16>
    %cst_26 = arith.constant dense<0.000000e+00> : vector<8x8xf32>
    %100 = tpu.matmul %98, %99, %cst_26 {dimension_numbers = #tpu.dot_dimension_numbers<[1], [0], [0], [1], [0, 0, 1, 1], [], []>} : vector<8x8xbf16>, vector<8x8xbf16>, vector<8x8xf32> -> vector<8x8xf32>
    %101 = vector.extract_strided_slice %82 {offsets = [0, 8], sizes = [8, 8], strides = [1, 1]} : vector<8x32xbf16> to vector<8x8xbf16>
    %102 = vector.extract_strided_slice %83 {offsets = [0, 8], sizes = [8, 8], strides = [1, 1]} : vector<8x32xbf16> to vector<8x8xbf16>
    %cst_27 = arith.constant dense<0.000000e+00> : vector<8x8xf32>
    %103 = tpu.matmul %101, %102, %cst_27 {dimension_numbers = #tpu.dot_dimension_numbers<[1], [1], [0], [0], [0, 0, 1, 0], [], []>} : vector<8x8xbf16>, vector<8x8xbf16>, vector<8x8xf32> -> vector<8x8xf32>
    %cst_28 = arith.constant dense<0xFF800000> : vector<8xf32>
    %104 = vector.multi_reduction <maximumf>, %103, %cst_28 [1] : vector<8x8xf32> to vector<8xf32>
    %105 = vector.shape_cast %104 : vector<8xf32> to vector<8x1xf32>
    %106 = vector.broadcast %105 : vector<8x1xf32> to vector<8x8xf32>
    %107 = arith.subf %103, %106 : vector<8x8xf32>
    %108 = math.exp %107 : vector<8x8xf32>
    %cst_29 = arith.constant dense<0.000000e+00> : vector<8xf32>
    %109 = vector.multi_reduction <add>, %108, %cst_29 [1] : vector<8x8xf32> to vector<8xf32>
    %110 = vector.shape_cast %109 : vector<8xf32> to vector<8x1xf32>
    %111 = tpu.reciprocal %110 {approx = true} : vector<8x1xf32> -> vector<8x1xf32>
    %112 = vector.broadcast %111 : vector<8x1xf32> to vector<8x8xf32>
    %113 = arith.mulf %108, %112 : vector<8x8xf32>
    %114 = arith.truncf %113 : vector<8x8xf32> to vector<8x8xbf16>
    %115 = vector.extract_strided_slice %84 {offsets = [0, 8], sizes = [8, 8], strides = [1, 1]} : vector<8x32xbf16> to vector<8x8xbf16>
    %cst_30 = arith.constant dense<0.000000e+00> : vector<8x8xf32>
    %116 = tpu.matmul %114, %115, %cst_30 {dimension_numbers = #tpu.dot_dimension_numbers<[1], [0], [0], [1], [0, 0, 1, 1], [], []>} : vector<8x8xbf16>, vector<8x8xbf16>, vector<8x8xf32> -> vector<8x8xf32>
    %117 = vector.extract_strided_slice %82 {offsets = [0, 16], sizes = [8, 8], strides = [1, 1]} : vector<8x32xbf16> to vector<8x8xbf16>
    %118 = vector.extract_strided_slice %83 {offsets = [0, 16], sizes = [8, 8], strides = [1, 1]} : vector<8x32xbf16> to vector<8x8xbf16>
    %cst_31 = arith.constant dense<0.000000e+00> : vector<8x8xf32>
    %119 = tpu.matmul %117, %118, %cst_31 {dimension_numbers = #tpu.dot_dimension_numbers<[1], [1], [0], [0], [0, 0, 1, 0], [], []>} : vector<8x8xbf16>, vector<8x8xbf16>, vector<8x8xf32> -> vector<8x8xf32>
    %cst_32 = arith.constant dense<0xFF800000> : vector<8xf32>
    %120 = vector.multi_reduction <maximumf>, %119, %cst_32 [1] : vector<8x8xf32> to vector<8xf32>
    %121 = vector.shape_cast %120 : vector<8xf32> to vector<8x1xf32>
    %122 = vector.broadcast %121 : vector<8x1xf32> to vector<8x8xf32>
    %123 = arith.subf %119, %122 : vector<8x8xf32>
    %124 = math.exp %123 : vector<8x8xf32>
    %cst_33 = arith.constant dense<0.000000e+00> : vector<8xf32>
    %125 = vector.multi_reduction <add>, %124, %cst_33 [1] : vector<8x8xf32> to vector<8xf32>
    %126 = vector.shape_cast %125 : vector<8xf32> to vector<8x1xf32>
    %127 = tpu.reciprocal %126 {approx = true} : vector<8x1xf32> -> vector<8x1xf32>
    %128 = vector.broadcast %127 : vector<8x1xf32> to vector<8x8xf32>
    %129 = arith.mulf %124, %128 : vector<8x8xf32>
    %130 = arith.truncf %129 : vector<8x8xf32> to vector<8x8xbf16>
    %131 = vector.extract_strided_slice %84 {offsets = [0, 16], sizes = [8, 8], strides = [1, 1]} : vector<8x32xbf16> to vector<8x8xbf16>
    %cst_34 = arith.constant dense<0.000000e+00> : vector<8x8xf32>
    %132 = tpu.matmul %130, %131, %cst_34 {dimension_numbers = #tpu.dot_dimension_numbers<[1], [0], [0], [1], [0, 0, 1, 1], [], []>} : vector<8x8xbf16>, vector<8x8xbf16>, vector<8x8xf32> -> vector<8x8xf32>
    %133 = vector.extract_strided_slice %82 {offsets = [0, 24], sizes = [8, 8], strides = [1, 1]} : vector<8x32xbf16> to vector<8x8xbf16>
    %134 = vector.extract_strided_slice %83 {offsets = [0, 24], sizes = [8, 8], strides = [1, 1]} : vector<8x32xbf16> to vector<8x8xbf16>
    %cst_35 = arith.constant dense<0.000000e+00> : vector<8x8xf32>
    %135 = tpu.matmul %133, %134, %cst_35 {dimension_numbers = #tpu.dot_dimension_numbers<[1], [1], [0], [0], [0, 0, 1, 0], [], []>} : vector<8x8xbf16>, vector<8x8xbf16>, vector<8x8xf32> -> vector<8x8xf32>
    %cst_36 = arith.constant dense<0xFF800000> : vector<8xf32>
    %136 = vector.multi_reduction <maximumf>, %135, %cst_36 [1] : vector<8x8xf32> to vector<8xf32>
    %137 = vector.shape_cast %136 : vector<8xf32> to vector<8x1xf32>
    %138 = vector.broadcast %137 : vector<8x1xf32> to vector<8x8xf32>
    %139 = arith.subf %135, %138 : vector<8x8xf32>
    %140 = math.exp %139 : vector<8x8xf32>
    %cst_37 = arith.constant dense<0.000000e+00> : vector<8xf32>
    %141 = vector.multi_reduction <add>, %140, %cst_37 [1] : vector<8x8xf32> to vector<8xf32>
    %142 = vector.shape_cast %141 : vector<8xf32> to vector<8x1xf32>
    %143 = tpu.reciprocal %142 {approx = true} : vector<8x1xf32> -> vector<8x1xf32>
    %144 = vector.broadcast %143 : vector<8x1xf32> to vector<8x8xf32>
    %145 = arith.mulf %140, %144 : vector<8x8xf32>
    %146 = arith.truncf %145 : vector<8x8xf32> to vector<8x8xbf16>
    %147 = vector.extract_strided_slice %84 {offsets = [0, 24], sizes = [8, 8], strides = [1, 1]} : vector<8x32xbf16> to vector<8x8xbf16>
    %cst_38 = arith.constant dense<0.000000e+00> : vector<8x8xf32>
    %148 = tpu.matmul %146, %147, %cst_38 {dimension_numbers = #tpu.dot_dimension_numbers<[1], [0], [0], [1], [0, 0, 1, 1], [], []>} : vector<8x8xbf16>, vector<8x8xbf16>, vector<8x8xf32> -> vector<8x8xf32>
    %149 = tpu.concatenate %100, %116, %132, %148 in 1 : vector<8x8xf32>, vector<8x8xf32>, vector<8x8xf32>, vector<8x8xf32> -> vector<8x32xf32>
    %150 = tpu.concatenate %81, %149 in 0 : vector<8x32xf32>, vector<8x32xf32> -> vector<16x32xf32>
    %151 = arith.truncf %150 : vector<16x32xf32> to vector<16x32xbf16>
    %c0_39 = arith.constant 0 : index
    %c0_40 = arith.constant 0 : index
    %152 = vector.load %arg4[%c0_39, %c0_40] : memref<32x32xbf16, #tpu.memory_space<vmem>>, vector<32x32xbf16>
    %cst_41 = arith.constant dense<0.000000e+00> : vector<16x32xf32>
    %153 = tpu.matmul %151, %152, %cst_41 {dimension_numbers = #tpu.dot_dimension_numbers<[1], [0], [0], [1], [0, 0, 1, 1], [], []>} : vector<16x32xbf16>, vector<32x32xbf16>, vector<16x32xf32> -> vector<16x32xf32>
    %c0_42 = arith.constant 0 : index
    %c0_43 = arith.constant 0 : index
    %154 = vector.load %arg5[%c0_42, %c0_43] : memref<1x32xf32, #tpu.memory_space<vmem>>, vector<1x32xf32>
    %155 = vector.broadcast %154 : vector<1x32xf32> to vector<16x32xf32>
    %156 = arith.addf %153, %155 : vector<16x32xf32>
    %157 = arith.addf %0, %156 : vector<16x32xf32>
    %cst_44 = arith.constant dense<0.000000e+00> : vector<16xf32>
    %158 = vector.multi_reduction <add>, %157, %cst_44 [1] : vector<16x32xf32> to vector<16xf32>
    %159 = vector.shape_cast %158 : vector<16xf32> to vector<16x1xf32>
    %cst_45 = arith.constant 3.200000e+01 : f32
    %160 = vector.broadcast %cst_45 : f32 to vector<16x1xf32>
    %161 = arith.divf %159, %160 : vector<16x1xf32>
    %162 = vector.broadcast %161 : vector<16x1xf32> to vector<16x32xf32>
    %163 = arith.subf %157, %162 : vector<16x32xf32>
    %164 = arith.mulf %163, %163 : vector<16x32xf32>
    %cst_46 = arith.constant dense<0.000000e+00> : vector<16xf32>
    %165 = vector.multi_reduction <add>, %164, %cst_46 [1] : vector<16x32xf32> to vector<16xf32>
    %166 = vector.shape_cast %165 : vector<16xf32> to vector<16x1xf32>
    %cst_47 = arith.constant 3.200000e+01 : f32
    %167 = vector.broadcast %cst_47 : f32 to vector<16x1xf32>
    %168 = arith.divf %166, %167 : vector<16x1xf32>
    %cst_48 = arith.constant 9.99999974E-6 : f32
    %169 = vector.broadcast %cst_48 : f32 to vector<16x1xf32>
    %170 = arith.addf %168, %169 : vector<16x1xf32>
    %171 = math.rsqrt %170 : vector<16x1xf32>
    %172 = vector.broadcast %171 : vector<16x1xf32> to vector<16x32xf32>
    %173 = arith.mulf %163, %172 : vector<16x32xf32>
    %c0_49 = arith.constant 0 : index
    %c0_50 = arith.constant 0 : index
    %174 = vector.load %arg6[%c0_49, %c0_50] : memref<1x32xf32, #tpu.memory_space<vmem>>, vector<1x32xf32>
    %175 = vector.broadcast %174 : vector<1x32xf32> to vector<16x32xf32>
    %176 = arith.mulf %173, %175 : vector<16x32xf32>
    %c0_51 = arith.constant 0 : index
    %c0_52 = arith.constant 0 : index
    %177 = vector.load %arg7[%c0_51, %c0_52] : memref<1x32xf32, #tpu.memory_space<vmem>>, vector<1x32xf32>
    %178 = vector.broadcast %177 : vector<1x32xf32> to vector<16x32xf32>
    %179 = arith.addf %176, %178 : vector<16x32xf32>
    %180 = arith.truncf %179 : vector<16x32xf32> to vector<16x32xbf16>
    %c0_53 = arith.constant 0 : index
    %c0_54 = arith.constant 0 : index
    %181 = vector.load %arg8[%c0_53, %c0_54] : memref<32x32xbf16, #tpu.memory_space<vmem>>, vector<32x32xbf16>
    %cst_55 = arith.constant dense<0.000000e+00> : vector<16x32xf32>
    %182 = tpu.matmul %180, %181, %cst_55 {dimension_numbers = #tpu.dot_dimension_numbers<[1], [0], [0], [1], [0, 0, 1, 1], [], []>} : vector<16x32xbf16>, vector<32x32xbf16>, vector<16x32xf32> -> vector<16x32xf32>
    %c0_56 = arith.constant 0 : index
    %c0_57 = arith.constant 0 : index
    %183 = vector.load %arg9[%c0_56, %c0_57] : memref<1x32xf32, #tpu.memory_space<vmem>>, vector<1x32xf32>
    %184 = vector.broadcast %183 : vector<1x32xf32> to vector<16x32xf32>
    %185 = arith.addf %182, %184 : vector<16x32xf32>
    %c0_58 = arith.constant 0 : index
    %c0_59 = arith.constant 0 : index
    %186 = vector.load %arg10[%c0_58, %c0_59] : memref<32x64xbf16, #tpu.memory_space<vmem>>, vector<32x64xbf16>
    %cst_60 = arith.constant dense<0.000000e+00> : vector<16x64xf32>
    %187 = tpu.matmul %1, %186, %cst_60 {dimension_numbers = #tpu.dot_dimension_numbers<[1], [0], [0], [1], [0, 0, 1, 1], [], []>} : vector<16x32xbf16>, vector<32x64xbf16>, vector<16x64xf32> -> vector<16x64xf32>
    %c0_61 = arith.constant 0 : index
    %c0_62 = arith.constant 0 : index
    %188 = vector.load %arg11[%c0_61, %c0_62] : memref<1x64xf32, #tpu.memory_space<vmem>>, vector<1x64xf32>
    %189 = vector.broadcast %188 : vector<1x64xf32> to vector<16x64xf32>
    %190 = arith.addf %187, %189 : vector<16x64xf32>
    %191 = vector.extract_strided_slice %190 {offsets = [0, 0], sizes = [16, 32], strides = [1, 1]} : vector<16x64xf32> to vector<16x32xf32>
    %192 = vector.extract_strided_slice %190 {offsets = [0, 32], sizes = [16, 32], strides = [1, 1]} : vector<16x64xf32> to vector<16x32xf32>
    %193 = arith.truncf %185 : vector<16x32xf32> to vector<16x32xbf16>
    %194 = arith.truncf %191 : vector<16x32xf32> to vector<16x32xbf16>
    %195 = arith.truncf %192 : vector<16x32xf32> to vector<16x32xbf16>
    %196 = vector.extract_strided_slice %193 {offsets = [0, 0], sizes = [8, 32], strides = [1, 1]} : vector<16x32xbf16> to vector<8x32xbf16>
    %197 = vector.extract_strided_slice %194 {offsets = [0, 0], sizes = [8, 32], strides = [1, 1]} : vector<16x32xbf16> to vector<8x32xbf16>
    %198 = vector.extract_strided_slice %195 {offsets = [0, 0], sizes = [8, 32], strides = [1, 1]} : vector<16x32xbf16> to vector<8x32xbf16>
    %199 = vector.extract_strided_slice %196 {offsets = [0, 0], sizes = [8, 8], strides = [1, 1]} : vector<8x32xbf16> to vector<8x8xbf16>
    %200 = vector.extract_strided_slice %197 {offsets = [0, 0], sizes = [8, 8], strides = [1, 1]} : vector<8x32xbf16> to vector<8x8xbf16>
    %cst_63 = arith.constant dense<0.000000e+00> : vector<8x8xf32>
    %201 = tpu.matmul %199, %200, %cst_63 {dimension_numbers = #tpu.dot_dimension_numbers<[1], [1], [0], [0], [0, 0, 1, 0], [], []>} : vector<8x8xbf16>, vector<8x8xbf16>, vector<8x8xf32> -> vector<8x8xf32>
    %cst_64 = arith.constant dense<0xFF800000> : vector<8xf32>
    %202 = vector.multi_reduction <maximumf>, %201, %cst_64 [1] : vector<8x8xf32> to vector<8xf32>
    %203 = vector.shape_cast %202 : vector<8xf32> to vector<8x1xf32>
    %204 = vector.broadcast %203 : vector<8x1xf32> to vector<8x8xf32>
    %205 = arith.subf %201, %204 : vector<8x8xf32>
    %206 = math.exp %205 : vector<8x8xf32>
    %cst_65 = arith.constant dense<0.000000e+00> : vector<8xf32>
    %207 = vector.multi_reduction <add>, %206, %cst_65 [1] : vector<8x8xf32> to vector<8xf32>
    %208 = vector.shape_cast %207 : vector<8xf32> to vector<8x1xf32>
    %209 = tpu.reciprocal %208 {approx = true} : vector<8x1xf32> -> vector<8x1xf32>
    %210 = vector.broadcast %209 : vector<8x1xf32> to vector<8x8xf32>
    %211 = arith.mulf %206, %210 : vector<8x8xf32>
    %212 = arith.truncf %211 : vector<8x8xf32> to vector<8x8xbf16>
    %213 = vector.extract_strided_slice %198 {offsets = [0, 0], sizes = [8, 8], strides = [1, 1]} : vector<8x32xbf16> to vector<8x8xbf16>
    %cst_66 = arith.constant dense<0.000000e+00> : vector<8x8xf32>
    %214 = tpu.matmul %212, %213, %cst_66 {dimension_numbers = #tpu.dot_dimension_numbers<[1], [0], [0], [1], [0, 0, 1, 1], [], []>} : vector<8x8xbf16>, vector<8x8xbf16>, vector<8x8xf32> -> vector<8x8xf32>
    %215 = vector.extract_strided_slice %196 {offsets = [0, 8], sizes = [8, 8], strides = [1, 1]} : vector<8x32xbf16> to vector<8x8xbf16>
    %216 = vector.extract_strided_slice %197 {offsets = [0, 8], sizes = [8, 8], strides = [1, 1]} : vector<8x32xbf16> to vector<8x8xbf16>
    %cst_67 = arith.constant dense<0.000000e+00> : vector<8x8xf32>
    %217 = tpu.matmul %215, %216, %cst_67 {dimension_numbers = #tpu.dot_dimension_numbers<[1], [1], [0], [0], [0, 0, 1, 0], [], []>} : vector<8x8xbf16>, vector<8x8xbf16>, vector<8x8xf32> -> vector<8x8xf32>
    %cst_68 = arith.constant dense<0xFF800000> : vector<8xf32>
    %218 = vector.multi_reduction <maximumf>, %217, %cst_68 [1] : vector<8x8xf32> to vector<8xf32>
    %219 = vector.shape_cast %218 : vector<8xf32> to vector<8x1xf32>
    %220 = vector.broadcast %219 : vector<8x1xf32> to vector<8x8xf32>
    %221 = arith.subf %217, %220 : vector<8x8xf32>
    %222 = math.exp %221 : vector<8x8xf32>
    %cst_69 = arith.constant dense<0.000000e+00> : vector<8xf32>
    %223 = vector.multi_reduction <add>, %222, %cst_69 [1] : vector<8x8xf32> to vector<8xf32>
    %224 = vector.shape_cast %223 : vector<8xf32> to vector<8x1xf32>
    %225 = tpu.reciprocal %224 {approx = true} : vector<8x1xf32> -> vector<8x1xf32>
    %226 = vector.broadcast %225 : vector<8x1xf32> to vector<8x8xf32>
    %227 = arith.mulf %222, %226 : vector<8x8xf32>
    %228 = arith.truncf %227 : vector<8x8xf32> to vector<8x8xbf16>
    %229 = vector.extract_strided_slice %198 {offsets = [0, 8], sizes = [8, 8], strides = [1, 1]} : vector<8x32xbf16> to vector<8x8xbf16>
    %cst_70 = arith.constant dense<0.000000e+00> : vector<8x8xf32>
    %230 = tpu.matmul %228, %229, %cst_70 {dimension_numbers = #tpu.dot_dimension_numbers<[1], [0], [0], [1], [0, 0, 1, 1], [], []>} : vector<8x8xbf16>, vector<8x8xbf16>, vector<8x8xf32> -> vector<8x8xf32>
    %231 = vector.extract_strided_slice %196 {offsets = [0, 16], sizes = [8, 8], strides = [1, 1]} : vector<8x32xbf16> to vector<8x8xbf16>
    %232 = vector.extract_strided_slice %197 {offsets = [0, 16], sizes = [8, 8], strides = [1, 1]} : vector<8x32xbf16> to vector<8x8xbf16>
    %cst_71 = arith.constant dense<0.000000e+00> : vector<8x8xf32>
    %233 = tpu.matmul %231, %232, %cst_71 {dimension_numbers = #tpu.dot_dimension_numbers<[1], [1], [0], [0], [0, 0, 1, 0], [], []>} : vector<8x8xbf16>, vector<8x8xbf16>, vector<8x8xf32> -> vector<8x8xf32>
    %cst_72 = arith.constant dense<0xFF800000> : vector<8xf32>
    %234 = vector.multi_reduction <maximumf>, %233, %cst_72 [1] : vector<8x8xf32> to vector<8xf32>
    %235 = vector.shape_cast %234 : vector<8xf32> to vector<8x1xf32>
    %236 = vector.broadcast %235 : vector<8x1xf32> to vector<8x8xf32>
    %237 = arith.subf %233, %236 : vector<8x8xf32>
    %238 = math.exp %237 : vector<8x8xf32>
    %cst_73 = arith.constant dense<0.000000e+00> : vector<8xf32>
    %239 = vector.multi_reduction <add>, %238, %cst_73 [1] : vector<8x8xf32> to vector<8xf32>
    %240 = vector.shape_cast %239 : vector<8xf32> to vector<8x1xf32>
    %241 = tpu.reciprocal %240 {approx = true} : vector<8x1xf32> -> vector<8x1xf32>
    %242 = vector.broadcast %241 : vector<8x1xf32> to vector<8x8xf32>
    %243 = arith.mulf %238, %242 : vector<8x8xf32>
    %244 = arith.truncf %243 : vector<8x8xf32> to vector<8x8xbf16>
    %245 = vector.extract_strided_slice %198 {offsets = [0, 16], sizes = [8, 8], strides = [1, 1]} : vector<8x32xbf16> to vector<8x8xbf16>
    %cst_74 = arith.constant dense<0.000000e+00> : vector<8x8xf32>
    %246 = tpu.matmul %244, %245, %cst_74 {dimension_numbers = #tpu.dot_dimension_numbers<[1], [0], [0], [1], [0, 0, 1, 1], [], []>} : vector<8x8xbf16>, vector<8x8xbf16>, vector<8x8xf32> -> vector<8x8xf32>
    %247 = vector.extract_strided_slice %196 {offsets = [0, 24], sizes = [8, 8], strides = [1, 1]} : vector<8x32xbf16> to vector<8x8xbf16>
    %248 = vector.extract_strided_slice %197 {offsets = [0, 24], sizes = [8, 8], strides = [1, 1]} : vector<8x32xbf16> to vector<8x8xbf16>
    %cst_75 = arith.constant dense<0.000000e+00> : vector<8x8xf32>
    %249 = tpu.matmul %247, %248, %cst_75 {dimension_numbers = #tpu.dot_dimension_numbers<[1], [1], [0], [0], [0, 0, 1, 0], [], []>} : vector<8x8xbf16>, vector<8x8xbf16>, vector<8x8xf32> -> vector<8x8xf32>
    %cst_76 = arith.constant dense<0xFF800000> : vector<8xf32>
    %250 = vector.multi_reduction <maximumf>, %249, %cst_76 [1] : vector<8x8xf32> to vector<8xf32>
    %251 = vector.shape_cast %250 : vector<8xf32> to vector<8x1xf32>
    %252 = vector.broadcast %251 : vector<8x1xf32> to vector<8x8xf32>
    %253 = arith.subf %249, %252 : vector<8x8xf32>
    %254 = math.exp %253 : vector<8x8xf32>
    %cst_77 = arith.constant dense<0.000000e+00> : vector<8xf32>
    %255 = vector.multi_reduction <add>, %254, %cst_77 [1] : vector<8x8xf32> to vector<8xf32>
    %256 = vector.shape_cast %255 : vector<8xf32> to vector<8x1xf32>
    %257 = tpu.reciprocal %256 {approx = true} : vector<8x1xf32> -> vector<8x1xf32>
    %258 = vector.broadcast %257 : vector<8x1xf32> to vector<8x8xf32>
    %259 = arith.mulf %254, %258 : vector<8x8xf32>
    %260 = arith.truncf %259 : vector<8x8xf32> to vector<8x8xbf16>
    %261 = vector.extract_strided_slice %198 {offsets = [0, 24], sizes = [8, 8], strides = [1, 1]} : vector<8x32xbf16> to vector<8x8xbf16>
    %cst_78 = arith.constant dense<0.000000e+00> : vector<8x8xf32>
    %262 = tpu.matmul %260, %261, %cst_78 {dimension_numbers = #tpu.dot_dimension_numbers<[1], [0], [0], [1], [0, 0, 1, 1], [], []>} : vector<8x8xbf16>, vector<8x8xbf16>, vector<8x8xf32> -> vector<8x8xf32>
    %263 = tpu.concatenate %214, %230, %246, %262 in 1 : vector<8x8xf32>, vector<8x8xf32>, vector<8x8xf32>, vector<8x8xf32> -> vector<8x32xf32>
    %264 = vector.extract_strided_slice %193 {offsets = [8, 0], sizes = [8, 32], strides = [1, 1]} : vector<16x32xbf16> to vector<8x32xbf16>
    %265 = vector.extract_strided_slice %194 {offsets = [8, 0], sizes = [8, 32], strides = [1, 1]} : vector<16x32xbf16> to vector<8x32xbf16>
    %266 = vector.extract_strided_slice %195 {offsets = [8, 0], sizes = [8, 32], strides = [1, 1]} : vector<16x32xbf16> to vector<8x32xbf16>
    %267 = vector.extract_strided_slice %264 {offsets = [0, 0], sizes = [8, 8], strides = [1, 1]} : vector<8x32xbf16> to vector<8x8xbf16>
    %268 = vector.extract_strided_slice %265 {offsets = [0, 0], sizes = [8, 8], strides = [1, 1]} : vector<8x32xbf16> to vector<8x8xbf16>
    %cst_79 = arith.constant dense<0.000000e+00> : vector<8x8xf32>
    %269 = tpu.matmul %267, %268, %cst_79 {dimension_numbers = #tpu.dot_dimension_numbers<[1], [1], [0], [0], [0, 0, 1, 0], [], []>} : vector<8x8xbf16>, vector<8x8xbf16>, vector<8x8xf32> -> vector<8x8xf32>
    %cst_80 = arith.constant dense<0xFF800000> : vector<8xf32>
    %270 = vector.multi_reduction <maximumf>, %269, %cst_80 [1] : vector<8x8xf32> to vector<8xf32>
    %271 = vector.shape_cast %270 : vector<8xf32> to vector<8x1xf32>
    %272 = vector.broadcast %271 : vector<8x1xf32> to vector<8x8xf32>
    %273 = arith.subf %269, %272 : vector<8x8xf32>
    %274 = math.exp %273 : vector<8x8xf32>
    %cst_81 = arith.constant dense<0.000000e+00> : vector<8xf32>
    %275 = vector.multi_reduction <add>, %274, %cst_81 [1] : vector<8x8xf32> to vector<8xf32>
    %276 = vector.shape_cast %275 : vector<8xf32> to vector<8x1xf32>
    %277 = tpu.reciprocal %276 {approx = true} : vector<8x1xf32> -> vector<8x1xf32>
    %278 = vector.broadcast %277 : vector<8x1xf32> to vector<8x8xf32>
    %279 = arith.mulf %274, %278 : vector<8x8xf32>
    %280 = arith.truncf %279 : vector<8x8xf32> to vector<8x8xbf16>
    %281 = vector.extract_strided_slice %266 {offsets = [0, 0], sizes = [8, 8], strides = [1, 1]} : vector<8x32xbf16> to vector<8x8xbf16>
    %cst_82 = arith.constant dense<0.000000e+00> : vector<8x8xf32>
    %282 = tpu.matmul %280, %281, %cst_82 {dimension_numbers = #tpu.dot_dimension_numbers<[1], [0], [0], [1], [0, 0, 1, 1], [], []>} : vector<8x8xbf16>, vector<8x8xbf16>, vector<8x8xf32> -> vector<8x8xf32>
    %283 = vector.extract_strided_slice %264 {offsets = [0, 8], sizes = [8, 8], strides = [1, 1]} : vector<8x32xbf16> to vector<8x8xbf16>
    %284 = vector.extract_strided_slice %265 {offsets = [0, 8], sizes = [8, 8], strides = [1, 1]} : vector<8x32xbf16> to vector<8x8xbf16>
    %cst_83 = arith.constant dense<0.000000e+00> : vector<8x8xf32>
    %285 = tpu.matmul %283, %284, %cst_83 {dimension_numbers = #tpu.dot_dimension_numbers<[1], [1], [0], [0], [0, 0, 1, 0], [], []>} : vector<8x8xbf16>, vector<8x8xbf16>, vector<8x8xf32> -> vector<8x8xf32>
    %cst_84 = arith.constant dense<0xFF800000> : vector<8xf32>
    %286 = vector.multi_reduction <maximumf>, %285, %cst_84 [1] : vector<8x8xf32> to vector<8xf32>
    %287 = vector.shape_cast %286 : vector<8xf32> to vector<8x1xf32>
    %288 = vector.broadcast %287 : vector<8x1xf32> to vector<8x8xf32>
    %289 = arith.subf %285, %288 : vector<8x8xf32>
    %290 = math.exp %289 : vector<8x8xf32>
    %cst_85 = arith.constant dense<0.000000e+00> : vector<8xf32>
    %291 = vector.multi_reduction <add>, %290, %cst_85 [1] : vector<8x8xf32> to vector<8xf32>
    %292 = vector.shape_cast %291 : vector<8xf32> to vector<8x1xf32>
    %293 = tpu.reciprocal %292 {approx = true} : vector<8x1xf32> -> vector<8x1xf32>
    %294 = vector.broadcast %293 : vector<8x1xf32> to vector<8x8xf32>
    %295 = arith.mulf %290, %294 : vector<8x8xf32>
    %296 = arith.truncf %295 : vector<8x8xf32> to vector<8x8xbf16>
    %297 = vector.extract_strided_slice %266 {offsets = [0, 8], sizes = [8, 8], strides = [1, 1]} : vector<8x32xbf16> to vector<8x8xbf16>
    %cst_86 = arith.constant dense<0.000000e+00> : vector<8x8xf32>
    %298 = tpu.matmul %296, %297, %cst_86 {dimension_numbers = #tpu.dot_dimension_numbers<[1], [0], [0], [1], [0, 0, 1, 1], [], []>} : vector<8x8xbf16>, vector<8x8xbf16>, vector<8x8xf32> -> vector<8x8xf32>
    %299 = vector.extract_strided_slice %264 {offsets = [0, 16], sizes = [8, 8], strides = [1, 1]} : vector<8x32xbf16> to vector<8x8xbf16>
    %300 = vector.extract_strided_slice %265 {offsets = [0, 16], sizes = [8, 8], strides = [1, 1]} : vector<8x32xbf16> to vector<8x8xbf16>
    %cst_87 = arith.constant dense<0.000000e+00> : vector<8x8xf32>
    %301 = tpu.matmul %299, %300, %cst_87 {dimension_numbers = #tpu.dot_dimension_numbers<[1], [1], [0], [0], [0, 0, 1, 0], [], []>} : vector<8x8xbf16>, vector<8x8xbf16>, vector<8x8xf32> -> vector<8x8xf32>
    %cst_88 = arith.constant dense<0xFF800000> : vector<8xf32>
    %302 = vector.multi_reduction <maximumf>, %301, %cst_88 [1] : vector<8x8xf32> to vector<8xf32>
    %303 = vector.shape_cast %302 : vector<8xf32> to vector<8x1xf32>
    %304 = vector.broadcast %303 : vector<8x1xf32> to vector<8x8xf32>
    %305 = arith.subf %301, %304 : vector<8x8xf32>
    %306 = math.exp %305 : vector<8x8xf32>
    %cst_89 = arith.constant dense<0.000000e+00> : vector<8xf32>
    %307 = vector.multi_reduction <add>, %306, %cst_89 [1] : vector<8x8xf32> to vector<8xf32>
    %308 = vector.shape_cast %307 : vector<8xf32> to vector<8x1xf32>
    %309 = tpu.reciprocal %308 {approx = true} : vector<8x1xf32> -> vector<8x1xf32>
    %310 = vector.broadcast %309 : vector<8x1xf32> to vector<8x8xf32>
    %311 = arith.mulf %306, %310 : vector<8x8xf32>
    %312 = arith.truncf %311 : vector<8x8xf32> to vector<8x8xbf16>
    %313 = vector.extract_strided_slice %266 {offsets = [0, 16], sizes = [8, 8], strides = [1, 1]} : vector<8x32xbf16> to vector<8x8xbf16>
    %cst_90 = arith.constant dense<0.000000e+00> : vector<8x8xf32>
    %314 = tpu.matmul %312, %313, %cst_90 {dimension_numbers = #tpu.dot_dimension_numbers<[1], [0], [0], [1], [0, 0, 1, 1], [], []>} : vector<8x8xbf16>, vector<8x8xbf16>, vector<8x8xf32> -> vector<8x8xf32>
    %315 = vector.extract_strided_slice %264 {offsets = [0, 24], sizes = [8, 8], strides = [1, 1]} : vector<8x32xbf16> to vector<8x8xbf16>
    %316 = vector.extract_strided_slice %265 {offsets = [0, 24], sizes = [8, 8], strides = [1, 1]} : vector<8x32xbf16> to vector<8x8xbf16>
    %cst_91 = arith.constant dense<0.000000e+00> : vector<8x8xf32>
    %317 = tpu.matmul %315, %316, %cst_91 {dimension_numbers = #tpu.dot_dimension_numbers<[1], [1], [0], [0], [0, 0, 1, 0], [], []>} : vector<8x8xbf16>, vector<8x8xbf16>, vector<8x8xf32> -> vector<8x8xf32>
    %cst_92 = arith.constant dense<0xFF800000> : vector<8xf32>
    %318 = vector.multi_reduction <maximumf>, %317, %cst_92 [1] : vector<8x8xf32> to vector<8xf32>
    %319 = vector.shape_cast %318 : vector<8xf32> to vector<8x1xf32>
    %320 = vector.broadcast %319 : vector<8x1xf32> to vector<8x8xf32>
    %321 = arith.subf %317, %320 : vector<8x8xf32>
    %322 = math.exp %321 : vector<8x8xf32>
    %cst_93 = arith.constant dense<0.000000e+00> : vector<8xf32>
    %323 = vector.multi_reduction <add>, %322, %cst_93 [1] : vector<8x8xf32> to vector<8xf32>
    %324 = vector.shape_cast %323 : vector<8xf32> to vector<8x1xf32>
    %325 = tpu.reciprocal %324 {approx = true} : vector<8x1xf32> -> vector<8x1xf32>
    %326 = vector.broadcast %325 : vector<8x1xf32> to vector<8x8xf32>
    %327 = arith.mulf %322, %326 : vector<8x8xf32>
    %328 = arith.truncf %327 : vector<8x8xf32> to vector<8x8xbf16>
    %329 = vector.extract_strided_slice %266 {offsets = [0, 24], sizes = [8, 8], strides = [1, 1]} : vector<8x32xbf16> to vector<8x8xbf16>
    %cst_94 = arith.constant dense<0.000000e+00> : vector<8x8xf32>
    %330 = tpu.matmul %328, %329, %cst_94 {dimension_numbers = #tpu.dot_dimension_numbers<[1], [0], [0], [1], [0, 0, 1, 1], [], []>} : vector<8x8xbf16>, vector<8x8xbf16>, vector<8x8xf32> -> vector<8x8xf32>
    %331 = tpu.concatenate %282, %298, %314, %330 in 1 : vector<8x8xf32>, vector<8x8xf32>, vector<8x8xf32>, vector<8x8xf32> -> vector<8x32xf32>
    %332 = tpu.concatenate %263, %331 in 0 : vector<8x32xf32>, vector<8x32xf32> -> vector<16x32xf32>
    %333 = arith.truncf %332 : vector<16x32xf32> to vector<16x32xbf16>
    %c0_95 = arith.constant 0 : index
    %c0_96 = arith.constant 0 : index
    %334 = vector.load %arg12[%c0_95, %c0_96] : memref<32x32xbf16, #tpu.memory_space<vmem>>, vector<32x32xbf16>
    %cst_97 = arith.constant dense<0.000000e+00> : vector<16x32xf32>
    %335 = tpu.matmul %333, %334, %cst_97 {dimension_numbers = #tpu.dot_dimension_numbers<[1], [0], [0], [1], [0, 0, 1, 1], [], []>} : vector<16x32xbf16>, vector<32x32xbf16>, vector<16x32xf32> -> vector<16x32xf32>
    %c0_98 = arith.constant 0 : index
    %c0_99 = arith.constant 0 : index
    %336 = vector.load %arg13[%c0_98, %c0_99] : memref<1x32xf32, #tpu.memory_space<vmem>>, vector<1x32xf32>
    %337 = vector.broadcast %336 : vector<1x32xf32> to vector<16x32xf32>
    %338 = arith.addf %335, %337 : vector<16x32xf32>
    %339 = arith.addf %179, %338 : vector<16x32xf32>
    %cst_100 = arith.constant dense<0.000000e+00> : vector<16xf32>
    %340 = vector.multi_reduction <add>, %339, %cst_100 [1] : vector<16x32xf32> to vector<16xf32>
    %341 = vector.shape_cast %340 : vector<16xf32> to vector<16x1xf32>
    %cst_101 = arith.constant 3.200000e+01 : f32
    %342 = vector.broadcast %cst_101 : f32 to vector<16x1xf32>
    %343 = arith.divf %341, %342 : vector<16x1xf32>
    %344 = vector.broadcast %343 : vector<16x1xf32> to vector<16x32xf32>
    %345 = arith.subf %339, %344 : vector<16x32xf32>
    %346 = arith.mulf %345, %345 : vector<16x32xf32>
    %cst_102 = arith.constant dense<0.000000e+00> : vector<16xf32>
    %347 = vector.multi_reduction <add>, %346, %cst_102 [1] : vector<16x32xf32> to vector<16xf32>
    %348 = vector.shape_cast %347 : vector<16xf32> to vector<16x1xf32>
    %cst_103 = arith.constant 3.200000e+01 : f32
    %349 = vector.broadcast %cst_103 : f32 to vector<16x1xf32>
    %350 = arith.divf %348, %349 : vector<16x1xf32>
    %cst_104 = arith.constant 9.99999974E-6 : f32
    %351 = vector.broadcast %cst_104 : f32 to vector<16x1xf32>
    %352 = arith.addf %350, %351 : vector<16x1xf32>
    %353 = math.rsqrt %352 : vector<16x1xf32>
    %354 = vector.broadcast %353 : vector<16x1xf32> to vector<16x32xf32>
    %355 = arith.mulf %345, %354 : vector<16x32xf32>
    %c0_105 = arith.constant 0 : index
    %c0_106 = arith.constant 0 : index
    %356 = vector.load %arg14[%c0_105, %c0_106] : memref<1x32xf32, #tpu.memory_space<vmem>>, vector<1x32xf32>
    %357 = vector.broadcast %356 : vector<1x32xf32> to vector<16x32xf32>
    %358 = arith.mulf %355, %357 : vector<16x32xf32>
    %c0_107 = arith.constant 0 : index
    %c0_108 = arith.constant 0 : index
    %359 = vector.load %arg15[%c0_107, %c0_108] : memref<1x32xf32, #tpu.memory_space<vmem>>, vector<1x32xf32>
    %360 = vector.broadcast %359 : vector<1x32xf32> to vector<16x32xf32>
    %361 = arith.addf %358, %360 : vector<16x32xf32>
    %362 = arith.truncf %361 : vector<16x32xf32> to vector<16x32xbf16>
    %c0_109 = arith.constant 0 : index
    %c0_110 = arith.constant 0 : index
    %363 = vector.load %arg16[%c0_109, %c0_110] : memref<32x64xbf16, #tpu.memory_space<vmem>>, vector<32x64xbf16>
    %cst_111 = arith.constant dense<0.000000e+00> : vector<16x64xf32>
    %364 = tpu.matmul %362, %363, %cst_111 {dimension_numbers = #tpu.dot_dimension_numbers<[1], [0], [0], [1], [0, 0, 1, 1], [], []>} : vector<16x32xbf16>, vector<32x64xbf16>, vector<16x64xf32> -> vector<16x64xf32>
    %c0_112 = arith.constant 0 : index
    %c0_113 = arith.constant 0 : index
    %365 = vector.load %arg17[%c0_112, %c0_113] : memref<1x64xf32, #tpu.memory_space<vmem>>, vector<1x64xf32>
    %366 = vector.broadcast %365 : vector<1x64xf32> to vector<16x64xf32>
    %367 = arith.addf %364, %366 : vector<16x64xf32>
    %cst_114 = arith.constant 0.000000e+00 : f32
    %368 = vector.broadcast %cst_114 : f32 to vector<16x64xf32>
    %369 = arith.maximumf %367, %368 : vector<16x64xf32>
    %370 = arith.truncf %369 : vector<16x64xf32> to vector<16x64xbf16>
    %c0_115 = arith.constant 0 : index
    %c0_116 = arith.constant 0 : index
    %371 = vector.load %arg18[%c0_115, %c0_116] : memref<64x32xbf16, #tpu.memory_space<vmem>>, vector<64x32xbf16>
    %cst_117 = arith.constant dense<0.000000e+00> : vector<16x32xf32>
    %372 = tpu.matmul %370, %371, %cst_117 {dimension_numbers = #tpu.dot_dimension_numbers<[1], [0], [0], [1], [0, 0, 1, 1], [], []>} : vector<16x64xbf16>, vector<64x32xbf16>, vector<16x32xf32> -> vector<16x32xf32>
    %c0_118 = arith.constant 0 : index
    %c0_119 = arith.constant 0 : index
    %373 = vector.load %arg19[%c0_118, %c0_119] : memref<1x32xf32, #tpu.memory_space<vmem>>, vector<1x32xf32>
    %374 = vector.broadcast %373 : vector<1x32xf32> to vector<16x32xf32>
    %375 = arith.addf %372, %374 : vector<16x32xf32>
    %376 = arith.addf %361, %375 : vector<16x32xf32>
    %cst_120 = arith.constant dense<0.000000e+00> : vector<16xf32>
    %377 = vector.multi_reduction <add>, %376, %cst_120 [1] : vector<16x32xf32> to vector<16xf32>
    %378 = vector.shape_cast %377 : vector<16xf32> to vector<16x1xf32>
    %cst_121 = arith.constant 3.200000e+01 : f32
    %379 = vector.broadcast %cst_121 : f32 to vector<16x1xf32>
    %380 = arith.divf %378, %379 : vector<16x1xf32>
    %381 = vector.broadcast %380 : vector<16x1xf32> to vector<16x32xf32>
    %382 = arith.subf %376, %381 : vector<16x32xf32>
    %383 = arith.mulf %382, %382 : vector<16x32xf32>
    %cst_122 = arith.constant dense<0.000000e+00> : vector<16xf32>
    %384 = vector.multi_reduction <add>, %383, %cst_122 [1] : vector<16x32xf32> to vector<16xf32>
    %385 = vector.shape_cast %384 : vector<16xf32> to vector<16x1xf32>
    %cst_123 = arith.constant 3.200000e+01 : f32
    %386 = vector.broadcast %cst_123 : f32 to vector<16x1xf32>
    %387 = arith.divf %385, %386 : vector<16x1xf32>
    %cst_124 = arith.constant 9.99999974E-6 : f32
    %388 = vector.broadcast %cst_124 : f32 to vector<16x1xf32>
    %389 = arith.addf %387, %388 : vector<16x1xf32>
    %390 = math.rsqrt %389 : vector<16x1xf32>
    %391 = vector.broadcast %390 : vector<16x1xf32> to vector<16x32xf32>
    %392 = arith.mulf %382, %391 : vector<16x32xf32>
    %c0_125 = arith.constant 0 : index
    %c0_126 = arith.constant 0 : index
    %393 = vector.load %arg20[%c0_125, %c0_126] : memref<1x32xf32, #tpu.memory_space<vmem>>, vector<1x32xf32>
    %394 = vector.broadcast %393 : vector<1x32xf32> to vector<16x32xf32>
    %395 = arith.mulf %392, %394 : vector<16x32xf32>
    %c0_127 = arith.constant 0 : index
    %c0_128 = arith.constant 0 : index
    %396 = vector.load %arg21[%c0_127, %c0_128] : memref<1x32xf32, #tpu.memory_space<vmem>>, vector<1x32xf32>
    %397 = vector.broadcast %396 : vector<1x32xf32> to vector<16x32xf32>
    %398 = arith.addf %395, %397 : vector<16x32xf32>
    %c0_129 = arith.constant 0 : index
    %c0_130 = arith.constant 0 : index
    %399 = vector.load %arg22[%c0_129, %c0_130] : memref<16x32xf32, #tpu.memory_space<vmem>>, vector<16x32xf32>
    tpu.vector_store %arg22[%c0_129, %c0_130], %398 {strides = array<i32>} : memref<16x32xf32, #tpu.memory_space<vmem>>, vector<16x32xf32>,
    return
  }
}

</mosaic_0001>

<bundles_post_ra>
// kernel: decoder_layer.1
= control target key start
LH: loop header
LB: loop body
LE: loop exit
PB: predicated region body
PF: predicated region fallthrough
CT: control target
= control target key end

     0   :  { %s3822_s0 = inlined_call_operand.vmem [shape: f32[16,32], index: 0, kind: input, shape index: {}]   ;;  %s3823_s1 = inlined_call_operand.vmem [shape: bf16[16,32], index: 1, kind: input, shape index: {}]   ;;  %s3824_s2 = inlined_call_operand.vmem [shape: bf16[32,96], index: 2, kind: input, shape index: {}]   ;;  %s3825_s3 = inlined_call_operand.vmem [shape: f32[1,96], index: 3, kind: input, shape index: {}]   ;;  %s3826_s4 = inlined_call_operand.vmem [shape: bf16[32,32], index: 4, kind: input, shape index: {}]   ;;  %s3827_s5 = inlined_call_operand.vmem [shape: f32[1,32], index: 5, kind: input, shape index: {}]   ;;  %s3828_s6 = inlined_call_operand.vmem [shape: f32[1,32], index: 6, kind: input, shape index: {}]   ;;  %s3829_s7 = inlined_call_operand.vmem [shape: f32[1,32], index: 7, kind: input, shape index: {}]   ;;  %s3830_s8 = inlined_call_operand.vmem [shape: bf16[32,32], index: 8, kind: input, shape index: {}]   ;;  %s3831_s9 = inlined_call_operand.vmem [shape: f32[1,32], index: 9, kind: input, shape index: {}]   ;;  %s3832_s10 = inlined_call_operand.vmem [shape: bf16[32,64], index: 10, kind: input, shape index: {}]   ;;  %s3833_s11 = inlined_call_operand.vmem [shape: f32[1,64], index: 11, kind: input, shape index: {}]   ;;  %s3834_s12 = inlined_call_operand.vmem [shape: bf16[32,32], index: 12, kind: input, shape index: {}]   ;;  %s3835_s13 = inlined_call_operand.vmem [shape: f32[1,32], index: 13, kind: input, shape index: {}]   ;;  %s3836_s14 = inlined_call_operand.vmem [shape: f32[1,32], index: 14, kind: input, shape index: {}]   ;;  %s3837_s15 = inlined_call_operand.vmem [shape: f32[1,32], index: 15, kind: input, shape index: {}]   ;;  %s3838_s16 = inlined_call_operand.vmem [shape: bf16[32,64], index: 16, kind: input, shape index: {}]   ;;  %s3839_s17 = inlined_call_operand.vmem [shape: f32[1,64], index: 17, kind: input, shape index: {}]   ;;  %s3840_s18 = inlined_call_operand.vmem [shape: bf16[64,32], index: 18, kind: input, shape index: {}]   ;;  %s3841_s19 = inlined_call_operand.vmem [shape: f32[1,32], index: 19, kind: input, shape index: {}]   ;;  %s3842_s20 = inlined_call_operand.vmem [shape: f32[1,32], index: 20, kind: input, shape index: {}]   ;;  %s3843_s21 = inlined_call_operand.vmem [shape: f32[1,32], index: 21, kind: input, shape index: {}]   ;;  %s3844_s22 = inlined_call_operand.hbm [shape: f32[16,32], index: 22, kind: output, shape index: {}]  }
   0x1   :  { %3854 = sst [smem:[#allocation5_spill]] %s3822_s0 }
   0x2   :  { %3855 = sst [smem:[#allocation6_spill]] %s3823_s1 }
   0x3   :  { %3856 = sst [smem:[#allocation7_spill]] %s3824_s2 }
   0x4   :  { %3857 = sst [smem:[#allocation8_spill]] %s3825_s3 }
   0x5   :  { %3858 = sst [smem:[#allocation9_spill]] %s3826_s4 }
   0x6   :  { %3859 = sst [smem:[#allocation10_spill]] %s3827_s5 }
   0x7   :  { %3860 = sst [smem:[#allocation11_spill]] %s3828_s6 }
   0x8   :  { %s3861_s29 = sld [smem:[#allocation7_spill]]  ;;  %v3128_v1 = vmov 0.0   ;;  %vm3129_vm0 = vmmov 0   ;;  %s3862_s1 = sld [smem:[#allocation5_spill]]  ;;  %vm101_vm1 = vcmask 261120  }
   0x9   :  { %2711 = vmatprep.subr.bf16.mxu1 %v3128_v1  ;;  %2725 = vmatprep.subr.bf16.mxu0 %v3128_v1 }
   0xa   :  { %2715 = vmatprep.mubr.msk.bf16.mxu1 %vm3129_vm0, %v3128_v1  ;;  %2727 = vmatprep.mubr.msk.bf16.mxu0 %vm3129_vm0, %v3128_v1 }
   0xe   :  { %v3011_v0 = vld [vmem:[%s3861_s29] sm:$0xff]   ;;  %v3012_v2 = vld [vmem:[%s3861_s29 + $0x8] sm:$0xff]  }
   0xf   :  { %2712 = vmatpush3.bf16.msra.mxu1 %v3011_v0  ;;  %v3274_v3 = vld [vmem:[%s3862_s1] sm:$0xff]  ;;  %v3279_v4 = vld [vmem:[%s3862_s1 + $0x8] sm:$0xff] }
  0x10   :  { %2713 = vmatprep.subr.bf16.mxu1 %v3128_v1  ;;  %v77_v5 = vpack.c.bf16 %v3279_v4, %v3274_v3 }
  0x13   :  { %2714 = vmatpush3.bf16.msra.mxu1 %v3012_v2 }
  0x14   :  { %2719 = vmatprep.subr.bf16.mxu1 %v3128_v1 }
  0x16   :  { %2716 = vmatmul.mubr.msk.bf16.vlgmr.msra.gmra.mrb[0].mxu1 %vm101_vm1, %v77_v5 }
  0x17   :  { %2721 = vmatprep.mubr.msk.bf16.mxu1 %vm3129_vm0, %v3128_v1 }
  0x18   :  { %27 = vsyncpa [#allocation3], 0  ;;  %s3863_s26 = sld [smem:[#allocation8_spill]]  ;;  %s3130_s2 = smov 120   ;;  %vm150_vm2 = vcmask 64512   ;;  %vm214_vm3 = vcmask 1043456  }
  0x19   :  { %s3131_s27 = smov 96   ;;  %s3132_s3 = smov 80   ;;  %vm601_vm4 = vcmask 130048   ;;  %vm603_vm5 = vcmask 195584   ;;  %vm2446_vm6 = vcmask 523264  }
  0x1a   :  { %s3133_s28 = smov 88   ;;  %s3852_s29 = smov 72  }
  0x1b   :  { %s3135_s30 = smov 112   ;;  %s3136_s4 = smov 104  }
  0x1c   :  { %s3137_s0 = smov 56   ;;  %s3138_s23 = smov 64  }
  0x1d   :  { %s3139_s1 = smov 48   ;;  %s3140_s5 = smov 40  }
  0x1e   :  { %v2555_v6 = vld [vmem:[%s3863_s26] ss:$0 sm:$0xff]  ;;  %s3864_s25 = sld [smem:[#allocation9_spill]]  ;;  %s3850_s26 = smov 8  }
  0xe9   :  { %v139_v7 = vpop.f32.mrb[0].mxu1 }
  0xea   :  { %v2717_v8 = vpop.f32.mrb[1].mxu1  ;;  %v140_v10 = vadd.f32 %v2555_v6, %v139_v7 }
  0xeb   :  { %v142_v9 = vpop.f32.mrb[2].mxu1 }
  0xec   :  { %v143_v11 = vadd.f32 %v2555_v6, %v142_v9  ;;  %v2718_v12 = vpop.f32.mrb[3].mxu1 }
  0xee   :  { %v3293_v13 = vpack.c.bf16 %v143_v11, %v140_v10 }
  0xf0   :  { %258 = vrot.lane.b32.xlu1 %v3293_v13, %s3130_s2  ;;  %148 = vrot.lane.b32.xlu0 %v3293_v13, %s3131_s27  ;;  %v3308_v14 = vrot.slane %v3293_v13, 4 }
  0xf4   :  { %370 = vrot.lane.b32.xlu1 %v3293_v13, %s3132_s3  ;;  %260 = vrot.lane.b32.xlu0 %v3293_v13, %s3133_s28 }
  0xf8   :  { %480 = vrot.lane.b32.xlu1 %v3293_v13, %s3852_s29  ;;  %368 = vrot.lane.b32.xlu0 %v3293_v13, %s3135_s30 }
  0xfc   :  { %478 = vrot.lane.b32.xlu0 %v3293_v13, %s3136_s4  ;;  %606 = vrot.lane.b32.xlu1 %v3308_v14, %s3131_s27 }
 0x100   :  { %716 = vrot.lane.b32.xlu0 %v3308_v14, %s3133_s28  ;;  %714 = vrot.lane.b32.xlu1 %v3308_v14, %s3130_s2 }
 0x104   :  { %826 = vrot.lane.b32.xlu0 %v3308_v14, %s3132_s3  ;;  %824 = vrot.lane.b32.xlu1 %v3308_v14, %s3135_s30 }
 0x108   :  { %936 = vrot.lane.b32.xlu0 %v3308_v14, %s3852_s29  ;;  %934 = vrot.lane.b32.xlu1 %v3308_v14, %s3136_s4 }
 0x162   :  { %v149_v15 = vpop.permute.xlu0 %148  ;;  %v259_v18 = vpop.permute.xlu1 %258 }
 0x163   :  { %v155_v16 = vsel %vm150_vm2, %v149_v15, 0 }
 0x164   :  { %2720 = vmatpush3.bf16.xpose.msra.mxu1 %v155_v16 }
 0x165   :  { %2731 = vmatprep.subr.bf16.mxu1 %v3128_v1 }
 0x166   :  { %v261_v17 = vpop.permute.xlu0 %260  ;;  %v371_v20 = vpop.permute.xlu1 %370 }
 0x167   :  { %v266_v19 = vsel %vm150_vm2, %v261_v17, 0  ;;  %v376_v21 = vsel %vm150_vm2, %v371_v20, 0 }
 0x16a   :  { %v481_v22 = vpop.permute.xlu1 %480  ;;  %v369_v23 = vpop.permute.xlu0 %368 }
 0x16b   :  { %2722 = vmatmul.mubr.msk.bf16.vlgmr.msra.gmra.mrb[4].mxu1 %vm150_vm2, %v3293_v13  ;;  %v486_v24 = vsel %vm150_vm2, %v481_v22, 0 }
 0x16c   :  { %2732 = vmatpush3.bf16.xpose.msra.mxu1 %v266_v19  ;;  %2733 = vmatprep.mubr.msk.bf16.mxu1 %vm3129_vm0, %v3128_v1 }
 0x16d   :  { %2743 = vmatprep.subr.bf16.mxu1 %v3128_v1 }
 0x16e   :  { %v607_v25 = vpop.permute.xlu1 %606  ;;  %v479_v26 = vpop.permute.xlu0 %478 }
 0x16f   :  { %v612_v27 = vsel %vm150_vm2, %v607_v25, 0 }
 0x172   :  { %v717_v28 = vpop.permute.xlu0 %716  ;;  %v715_v31 = vpop.permute.xlu1 %714 }
 0x173   :  { %2734 = vmatmul.mubr.msk.bf16.vlgmr.msra.gmra.mrb[8].mxu1 %vm150_vm2, %v259_v18  ;;  %v722_v29 = vsel %vm150_vm2, %v717_v28, 0 }
 0x174   :  { %2744 = vmatpush3.bf16.xpose.msra.mxu1 %v376_v21  ;;  %2745 = vmatprep.mubr.msk.bf16.mxu1 %vm3129_vm0, %v3128_v1 }
 0x175   :  { %2755 = vmatprep.subr.bf16.mxu1 %v3128_v1 }
 0x176   :  { %v827_v30 = vpop.permute.xlu0 %826  ;;  %v825_v34 = vpop.permute.xlu1 %824 }
 0x177   :  { %v832_v32 = vsel %vm150_vm2, %v827_v30, 0 }
 0x17a   :  { %v937_v33 = vpop.permute.xlu0 %936  ;;  %v935_v36 = vpop.permute.xlu1 %934 }
 0x17b   :  { %2746 = vmatmul.mubr.msk.bf16.vlgmr.msra.gmra.mrb[12].mxu1 %vm150_vm2, %v369_v23  ;;  %v942_v35 = vsel %vm150_vm2, %v937_v33, 0 }
 0x17c   :  { %2756 = vmatpush3.bf16.xpose.msra.mxu1 %v486_v24  ;;  %2757 = vmatprep.mubr.msk.bf16.mxu1 %vm3129_vm0, %v3128_v1 }
 0x17d   :  { %2767 = vmatprep.subr.bf16.mxu1 %v3128_v1 }
 0x183   :  { %2758 = vmatmul.mubr.msk.bf16.vlgmr.msra.gmra.mrb[16].mxu1 %vm150_vm2, %v479_v26 }
 0x184   :  { %2768 = vmatpush3.bf16.xpose.msra.mxu1 %v612_v27  ;;  %2769 = vmatprep.mubr.msk.bf16.mxu1 %vm3129_vm0, %v3128_v1 }
 0x185   :  { %2779 = vmatprep.subr.bf16.mxu1 %v3128_v1 }
 0x18b   :  { %2770 = vmatmul.mubr.msk.bf16.vlgmr.msra.gmra.mrb[20].mxu1 %vm150_vm2, %v3308_v14 }
 0x18c   :  { %2780 = vmatpush3.bf16.xpose.msra.mxu1 %v722_v29  ;;  %2781 = vmatprep.mubr.msk.bf16.mxu1 %vm3129_vm0, %v3128_v1 }
 0x18d   :  { %2791 = vmatprep.subr.bf16.mxu1 %v3128_v1 }
 0x193   :  { %2782 = vmatmul.mubr.msk.bf16.vlgmr.msra.gmra.mrb[24].mxu1 %vm150_vm2, %v715_v31 }
 0x194   :  { %2792 = vmatpush3.bf16.xpose.msra.mxu1 %v832_v32  ;;  %2793 = vmatprep.mubr.msk.bf16.mxu1 %vm3129_vm0, %v3128_v1 }
 0x195   :  { %2803 = vmatprep.subr.bf16.mxu1 %v3128_v1 }
 0x19b   :  { %2794 = vmatmul.mubr.msk.bf16.vlgmr.msra.gmra.mrb[28].mxu1 %vm150_vm2, %v825_v34 }
 0x19c   :  { %2804 = vmatpush3.bf16.xpose.msra.mxu1 %v942_v35  ;;  %2805 = vmatprep.mubr.msk.bf16.mxu1 %vm3129_vm0, %v3128_v1 }
 0x19d   :  { %2815 = vmatprep.subr.bf16.mxu1 %v3128_v1 }
 0x1a3   :  { %2806 = vmatmul.mubr.msk.bf16.vlgmr.msra.gmra.mrb[32].mxu1 %vm150_vm2, %v935_v36 }
 0x1a4   :  { %2819 = vmatprep.mubr.msk.bf16.mxu1 %vm3129_vm0, %v3128_v1 }
 0x23e   :  { %v191_v37 = vpop.f32.mrb[4].mxu1 }
 0x23f   :  { %v2723_v38 = vpop.f32.mrb[5].mxu1  ;;  %v197_v39 = vsel %vm150_vm2, %v191_v37, -inf }
 0x240   :  { %198 = vmax.xlane.f32.xlu0 %v197_v39  ;;  %v194_v40 = vpop.f32.mrb[6].mxu1 }
 0x241   :  { %v2724_v41 = vpop.f32.mrb[7].mxu1 }
 0x246   :  { %v302_v42 = vpop.f32.mrb[8].mxu1 }
 0x247   :  { %v2735_v43 = vpop.f32.mrb[9].mxu1  ;;  %v308_v44 = vsel %vm150_vm2, %v302_v42, -inf }
 0x248   :  { %309 = vmax.xlane.f32.xlu1 %v308_v44  ;;  %v305_v45 = vpop.f32.mrb[10].mxu1 }
 0x249   :  { %v2736_v46 = vpop.f32.mrb[11].mxu1 }
 0x24e   :  { %v412_v47 = vpop.f32.mrb[12].mxu1 }
 0x24f   :  { %v2747_v48 = vpop.f32.mrb[13].mxu1  ;;  %v418_v49 = vsel %vm150_vm2, %v412_v47, -inf }
 0x250   :  { %419 = vmax.xlane.f32.xlu0 %v418_v49  ;;  %v415_v50 = vpop.f32.mrb[14].mxu1 }
 0x251   :  { %v2748_v51 = vpop.f32.mrb[15].mxu1 }
 0x256   :  { %v3371_v52 = vpop.f32.mrb[16].mxu1 }
 0x257   :  { %v2759_v53 = vpop.f32.mrb[17].mxu1  ;;  %v528_v54 = vsel %vm150_vm2, %v3371_v52, -inf }
 0x258   :  { %529 = vmax.xlane.f32.xlu0 %v528_v54  ;;  %v525_v55 = vpop.f32.mrb[18].mxu1 }
 0x259   :  { %v2760_v56 = vpop.f32.mrb[19].mxu1 }
 0x25e   :  { %v3375_v57 = vpop.f32.mrb[20].mxu1 }
 0x25f   :  { %v2771_v58 = vpop.f32.mrb[21].mxu1  ;;  %v654_v59 = vsel %vm150_vm2, %v3375_v57, -inf }
 0x260   :  { %655 = vmax.xlane.f32.xlu1 %v654_v59  ;;  %v651_v60 = vpop.f32.mrb[22].mxu1 }
 0x261   :  { %v2772_v61 = vpop.f32.mrb[23].mxu1 }
 0x266   :  { %v3379_v62 = vpop.f32.mrb[24].mxu1 }
 0x267   :  { %v2783_v63 = vpop.f32.mrb[25].mxu1  ;;  %v764_v0 = vsel %vm150_vm2, %v3379_v62, -inf }
 0x268   :  { %765 = vmax.xlane.f32.xlu0 %v764_v0  ;;  %v761_v2 = vpop.f32.mrb[26].mxu1 }
 0x269   :  { %v2784_v5 = vpop.f32.mrb[27].mxu1 }
 0x26e   :  { %v868_v6 = vpop.f32.mrb[28].mxu1 }
 0x26f   :  { %v2795_v7 = vpop.f32.mrb[29].mxu1  ;;  %v874_v8 = vsel %vm150_vm2, %v868_v6, -inf }
 0x270   :  { %875 = vmax.xlane.f32.xlu1 %v874_v8  ;;  %v871_v9 = vpop.f32.mrb[30].mxu1 }
 0x271   :  { %v2796_v10 = vpop.f32.mrb[31].mxu1 }
 0x276   :  { %v3384_v11 = vpop.f32.mrb[32].mxu1 }
 0x277   :  { %v2807_v12 = vpop.f32.mrb[33].mxu1  ;;  %v984_v17 = vsel %vm150_vm2, %v3384_v11, -inf }
 0x278   :  { %v981_v15 = vpop.f32.mrb[34].mxu1 }
 0x279   :  { %v2808_v16 = vpop.f32.mrb[35].mxu1 }
 0x27e   :  { %320 = vrot.lane.b32.xlu0 %v3293_v13, %s3137_s0 }
 0x281   :  { %209 = vrot.lane.b32.xlu1 %v3293_v13, %s3138_s23 }
 0x29d   :  { %985 = vmax.xlane.f32.xlu0 %v984_v17 }
 0x2cd   :  { %v199_v18 = vpop.xlane.xlu0 %198 }
 0x2ce   :  { %v200_v19 = vsub.f32 %v191_v37, %v199_v18 }
 0x2d0   :  { %v201_v20 = vmul.f32 1.442695, %v200_v19 }
 0x2d2   :  { %3028 = vpow2.f32 %v201_v20 }
 0x2d5   :  { %v310_v21 = vpop.xlane.xlu1 %309 }
 0x2d6   :  { %v311_v22 = vsub.f32 %v302_v42, %v310_v21 }
 0x2d8   :  { %v312_v23 = vmul.f32 1.442695, %v311_v22 }
 0x2da   :  { %3030 = vpow2.f32 %v312_v23 }
 0x2dc   :  { %v3392_v24 = vpop.eup %3028 }
 0x2dd   :  { %v420_v25 = vpop.xlane.xlu0 %419  ;;  %v203_v26 = vsel %vm150_vm2, %v3392_v24, 0.0 }
 0x2de   :  { %v421_v27 = vsub.f32 %v412_v47, %v420_v25  ;;  %204 = vadd.xlane.f32.xlu1 %v203_v26 }
 0x2e0   :  { %v422_v28 = vmul.f32 1.442695, %v421_v27 }
 0x2e2   :  { %3032 = vpow2.f32 %v422_v28 }
 0x2e4   :  { %v3396_v29 = vpop.eup %3030 }
 0x2e5   :  { %v314_v30 = vsel %vm150_vm2, %v3396_v29, 0.0  ;;  %v530_v36 = vpop.xlane.xlu0 %529 }
 0x2e6   :  { %315 = vadd.xlane.f32.xlu0 %v314_v30  ;;  %v531_v38 = vsub.f32 %v3371_v52, %v530_v36 }
 0x2e8   :  { %v532_v39 = vmul.f32 1.442695, %v531_v38 }
 0x2ea   :  { %3034 = vpow2.f32 %v532_v39 }
 0x2ec   :  { %v3400_v31 = vpop.eup %3032 }
 0x2ed   :  { %v424_v32 = vsel %vm150_vm2, %v3400_v31, 0.0  ;;  %v656_v33 = vpop.xlane.xlu1 %655 }
 0x2ee   :  { %425 = vadd.xlane.f32.xlu1 %v424_v32  ;;  %v657_v40 = vsub.f32 %v3375_v57, %v656_v33 }
 0x2f0   :  { %v658_v43 = vmul.f32 1.442695, %v657_v40 }
 0x2f2   :  { %3036 = vpow2.f32 %v658_v43 }
 0x2f4   :  { %v3035_v46 = vpop.eup %3034 }
 0x2f5   :  { %v766_v41 = vpop.xlane.xlu0 %765  ;;  %v534_v47 = vsel %vm150_vm2, %v3035_v46, 0.0 }
 0x2f6   :  { %v767_v42 = vsub.f32 %v3379_v62, %v766_v41 }
 0x2f9   :  { %v321_v54 = vpop.permute.xlu0 %320 }
 0x2fa   :  { %v326_v2 = vsel %vm214_vm3, %v321_v54, 0 }
 0x2fc   :  { %430 = vrot.lane.b32.xlu0 %v3293_v13, %s3139_s1  ;;  %v3414_v48 = vpop.eup %3036 }
 0x2fd   :  { %v876_v34 = vpop.xlane.xlu1 %875  ;;  %v660_v50 = vsel %vm150_vm2, %v3414_v48, 0.0 }
 0x2fe   :  { %v877_v44 = vsub.f32 %v868_v6, %v876_v34 }
 0x2ff   :  { %540 = vrot.lane.b32.xlu1 %v3293_v13, %s3140_s5  ;;  %v768_v13 = vmul.f32 1.442695, %v767_v42 }
 0x300   :  { %v878_v45 = vmul.f32 1.442695, %v877_v44 }
 0x301   :  { %v210_v35 = vpop.permute.xlu1 %209  ;;  %3038 = vpow2.f32 %v768_v13 }
 0x302   :  { %v216_v37 = vsel %vm214_vm3, %v210_v35, 0  ;;  %3040 = vpow2.f32 %v878_v45 }
 0x303   :  { %2726 = vmatpush3.bf16.msra.mxu0 %v216_v37 }
 0x304   :  { %2737 = vmatprep.subr.bf16.mxu0 %v3128_v1 }
 0x30b   :  { %v3416_v49 = vpop.eup %3038 }
 0x30c   :  { %v3420_v51 = vpop.eup %3040  ;;  %v770_v52 = vsel %vm150_vm2, %v3416_v49, 0.0 }
 0x30d   :  { %v880_v53 = vsel %vm150_vm2, %v3420_v51, 0.0 }
 0x31b   :  { %535 = vadd.xlane.f32.xlu0 %v534_v47 }
 0x31f   :  { %661 = vadd.xlane.f32.xlu0 %v660_v50 }
 0x323   :  { %771 = vadd.xlane.f32.xlu1 %v770_v52  ;;  %881 = vadd.xlane.f32.xlu0 %v880_v53 }
 0x32a   :  { %v986_v55 = vpop.xlane.xlu0 %985 }
 0x32b   :  { %v987_v56 = vsub.f32 %v3384_v11, %v986_v55 }
 0x32d   :  { %v988_v57 = vmul.f32 1.442695, %v987_v56 }
 0x32f   :  { %3042 = vpow2.f32 %v988_v57 }
 0x334   :  { %776 = vrot.lane.b32.xlu1 %v3308_v14, %s3137_s0 }
 0x338   :  { %886 = vrot.lane.b32.xlu1 %v3308_v14, %s3139_s1  ;;  %s3849_s1 = smov 16  }
 0x339   :  { %v3431_v58 = vpop.eup %3042 }
 0x33a   :  { %v990_v59 = vsel %vm150_vm2, %v3431_v58, 0.0 }
 0x33b   :  { %991 = vadd.xlane.f32.xlu0 %v990_v59 }
 0x33c   :  { %996 = vrot.lane.b32.xlu1 %v3308_v14, %s3140_s5  ;;  %s3848_s5 = smov 24  }
 0x351   :  { %666 = vrot.lane.b32.xlu0 %v3308_v14, %s3138_s23 }
 0x36b   :  { %v205_v60 = vpop.xlane.xlu1 %204 }
 0x36c   :  { %3044 = vrcp.f32 %v205_v60 }
 0x373   :  { %v316_v61 = vpop.xlane.xlu0 %315 }
 0x374   :  { %3046 = vrcp.f32 %v316_v61 }
 0x376   :  { %v3045_v62 = vpop.eup %3044 }
 0x377   :  { %v207_v63 = vmul.f32 %v3045_v62, %v3392_v24  ;;  %v431_v7 = vpop.permute.xlu0 %430 }
 0x378   :  { %v436_v9 = vsel %vm214_vm3, %v431_v7, 0 }
 0x379   :  { %v208_v0 = vpack.c.bf16 %v207_v63, %v207_v63 }
 0x37b   :  { %2728 = vmatmul.mubr.msk.bf16.vlgmr.msra.gmra.mrb[0].mxu0 %vm150_vm2, %v208_v0  ;;  %v426_v5 = vpop.xlane.xlu1 %425 }
 0x37c   :  { %2738 = vmatpush3.bf16.msra.mxu0 %v326_v2  ;;  %3048 = vrcp.f32 %v426_v5  ;;  %2739 = vmatprep.mubr.msk.bf16.mxu0 %vm3129_vm0, %v3128_v1  ;;  %v3013_v2 = vld [vmem:[%s3864_s25] sm:$0xff]  }
 0x37d   :  { %2749 = vmatprep.subr.bf16.mxu0 %v3128_v1  ;;  %2816 = vmatpush3.bf16.msra.mxu1 %v3013_v2 }
 0x37e   :  { %v3047_v14 = vpop.eup %3046  ;;  %2817 = vmatprep.subr.bf16.mxu1 %v3128_v1 }
 0x37f   :  { %v318_v6 = vmul.f32 %v3047_v14, %v3396_v29  ;;  %v541_v12 = vpop.permute.xlu1 %540 }
 0x380   :  { %v546_v16 = vsel %vm214_vm3, %v541_v12, 0 }
 0x381   :  { %v319_v8 = vpack.c.bf16 %v318_v6, %v318_v6 }
 0x383   :  { %2740 = vmatmul.mubr.msk.bf16.vlgmr.msra.gmra.mrb[4].mxu0 %vm150_vm2, %v319_v8  ;;  %v3014_v8 = vld [vmem:[%s3864_s25 + $0x8] sm:$0xff]   ;;  %s3865_s25 = sld [smem:[#allocation10_spill]] }
 0x384   :  { %2750 = vmatpush3.bf16.msra.mxu0 %v436_v9  ;;  %2751 = vmatprep.mubr.msk.bf16.mxu0 %vm3129_vm0, %v3128_v1 }
 0x385   :  { %2761 = vmatprep.subr.bf16.mxu0 %v3128_v1  ;;  %2818 = vmatpush3.bf16.msra.mxu1 %v3014_v8 }
 0x386   :  { %v3049_v10 = vpop.eup %3048  ;;  %2831 = vmatprep.subr.bf16.mxu1 %v3128_v1 }
 0x387   :  { %v428_v11 = vmul.f32 %v3049_v10, %v3400_v31 }
 0x389   :  { %v429_v15 = vpack.c.bf16 %v428_v11, %v428_v11 }
 0x38b   :  { %2752 = vmatmul.mubr.msk.bf16.vlgmr.msra.gmra.mrb[8].mxu0 %vm150_vm2, %v429_v15 }
 0x38c   :  { %2762 = vmatpush3.bf16.msra.mxu0 %v546_v16  ;;  %2763 = vmatprep.mubr.msk.bf16.mxu0 %vm3129_vm0, %v3128_v1 }
 0x38d   :  { %2773 = vmatprep.subr.bf16.mxu0 %v3128_v1 }
 0x3a8   :  { %v536_v17 = vpop.xlane.xlu0 %535 }
 0x3a9   :  { %3050 = vrcp.f32 %v536_v17 }
 0x3ac   :  { %v662_v21 = vpop.xlane.xlu0 %661 }
 0x3ad   :  { %3052 = vrcp.f32 %v662_v21 }
 0x3b0   :  { %v772_v22 = vpop.xlane.xlu1 %771  ;;  %v882_v23 = vpop.xlane.xlu0 %881 }
 0x3b1   :  { %3054 = vrcp.f32 %v772_v22 }
 0x3b2   :  { %3056 = vrcp.f32 %v882_v23 }
 0x3b3   :  { %v3051_v18 = vpop.eup %3050 }
 0x3b4   :  { %v538_v19 = vmul.f32 %v3051_v18, %v3035_v46  ;;  %v777_v29 = vpop.permute.xlu1 %776 }
 0x3b5   :  { %v782_v32 = vsel %vm214_vm3, %v777_v29, 0 }
 0x3b6   :  { %v539_v20 = vpack.c.bf16 %v538_v19, %v538_v19 }
 0x3b7   :  { %v3053_v24 = vpop.eup %3052 }
 0x3b8   :  { %2764 = vmatmul.mubr.msk.bf16.vlgmr.msra.gmra.mrb[12].mxu0 %vm150_vm2, %v539_v20  ;;  %v664_v26 = vmul.f32 %v3053_v24, %v3414_v48  ;;  %v887_v34 = vpop.permute.xlu1 %886 }
 0x3b9   :  { %2775 = vmatprep.mubr.msk.bf16.mxu0 %vm3129_vm0, %v3128_v1  ;;  %v892_v37 = vsel %vm214_vm3, %v887_v34, 0 }
 0x3ba   :  { %v665_v30 = vpack.c.bf16 %v664_v26, %v664_v26 }
 0x3bb   :  { %v3055_v31 = vpop.eup %3054 }
 0x3bc   :  { %v774_v33 = vmul.f32 %v3055_v31, %v3416_v49  ;;  %v3057_v36 = vpop.eup %3056  ;;  %v997_v39 = vpop.permute.xlu1 %996 }
 0x3bd   :  { %v884_v38 = vmul.f32 %v3057_v36, %v3420_v51  ;;  %v1002_v42 = vsel %vm214_vm3, %v997_v39, 0 }
 0x3be   :  { %v775_v35 = vpack.c.bf16 %v774_v33, %v774_v33 }
 0x3bf   :  { %v885_v40 = vpack.c.bf16 %v884_v38, %v884_v38 }
 0x3c8   :  { %v992_v25 = vpop.xlane.xlu0 %991 }
 0x3c9   :  { %3058 = vrcp.f32 %v992_v25 }
 0x3cc   :  { %v667_v27 = vpop.permute.xlu0 %666 }
 0x3cd   :  { %v672_v28 = vsel %vm214_vm3, %v667_v27, 0 }
 0x3ce   :  { %2774 = vmatpush3.bf16.msra.mxu0 %v672_v28 }
 0x3cf   :  { %2785 = vmatprep.subr.bf16.mxu0 %v3128_v1 }
 0x3d1   :  { %2776 = vmatmul.mubr.msk.bf16.vlgmr.msra.gmra.mrb[16].mxu0 %vm150_vm2, %v665_v30 }
 0x3d2   :  { %2786 = vmatpush3.bf16.msra.mxu0 %v782_v32  ;;  %2787 = vmatprep.mubr.msk.bf16.mxu0 %vm3129_vm0, %v3128_v1 }
 0x3d3   :  { %2797 = vmatprep.subr.bf16.mxu0 %v3128_v1  ;;  %v3059_v41 = vpop.eup %3058 }
 0x3d4   :  { %v994_v43 = vmul.f32 %v3059_v41, %v3431_v58 }
 0x3d6   :  { %v995_v44 = vpack.c.bf16 %v994_v43, %v994_v43 }
 0x3d9   :  { %2788 = vmatmul.mubr.msk.bf16.vlgmr.msra.gmra.mrb[20].mxu0 %vm150_vm2, %v775_v35 }
 0x3da   :  { %2798 = vmatpush3.bf16.msra.mxu0 %v892_v37  ;;  %2799 = vmatprep.mubr.msk.bf16.mxu0 %vm3129_vm0, %v3128_v1  ;;  %v2575_v37 = vld [vmem:[%s3865_s25] ss:$0 sm:$0xff] }
 0x3db   :  { %2809 = vmatprep.subr.bf16.mxu0 %v3128_v1 }
 0x3e1   :  { %2800 = vmatmul.mubr.msk.bf16.vlgmr.msra.gmra.mrb[24].mxu0 %vm150_vm2, %v885_v40 }
 0x3e2   :  { %2810 = vmatpush3.bf16.msra.mxu0 %v1002_v42  ;;  %2811 = vmatprep.mubr.msk.bf16.mxu0 %vm3129_vm0, %v3128_v1 }
 0x3e3   :  { %2823 = vmatprep.subr.bf16.mxu0 %v3128_v1 }
 0x3e9   :  { %2812 = vmatmul.mubr.msk.bf16.vlgmr.msra.gmra.mrb[28].mxu0 %vm150_vm2, %v995_v44 }
 0x3ea   :  { %2827 = vmatprep.mubr.msk.bf16.mxu0 %vm3129_vm0, %v3128_v1 }
 0x44e   :  { %v252_v13 = vpop.f32.mrb[0].mxu0 }
 0x44f   :  { %v2729_v45 = vpop.f32.mrb[1].mxu0 }
 0x450   :  { %v255_v46 = vpop.f32.mrb[2].mxu0 }
 0x451   :  { %v2730_v47 = vpop.f32.mrb[3].mxu0 }
 0x456   :  { %v362_v48 = vpop.f32.mrb[4].mxu0 }
 0x457   :  { %v2741_v49 = vpop.f32.mrb[5].mxu0 }
 0x458   :  { %v365_v50 = vpop.f32.mrb[6].mxu0 }
 0x459   :  { %v2742_v51 = vpop.f32.mrb[7].mxu0 }
 0x45e   :  { %v472_v52 = vpop.f32.mrb[8].mxu0 }
 0x45f   :  { %v2753_v53 = vpop.f32.mrb[9].mxu0 }
 0x460   :  { %v475_v54 = vpop.f32.mrb[10].mxu0 }
 0x461   :  { %v2754_v55 = vpop.f32.mrb[11].mxu0 }
 0x48b   :  { %v582_v56 = vpop.f32.mrb[12].mxu0 }
 0x48c   :  { %v2765_v57 = vpop.f32.mrb[13].mxu0 }
 0x48d   :  { %v585_v58 = vpop.f32.mrb[14].mxu0 }
 0x48e   :  { %v2766_v59 = vpop.f32.mrb[15].mxu0  ;;  %v3018_v58 = vld [vmem:[%s3830_s8] sm:$0xff]  }
 0x48f   :  { %2824 = vmatpush3.bf16.msra.mxu0 %v3018_v58  ;;  %v3019_v59 = vld [vmem:[%s3830_s8 + $0x8] sm:$0xff]   ;;  %s3867_s8 = sld [smem:[#allocation11_spill]] }
 0x490   :  { %2825 = vmatprep.subr.bf16.mxu0 %v3128_v1 }
 0x493   :  { %2826 = vmatpush3.bf16.msra.mxu0 %v3019_v59 }
 0x494   :  { %2839 = vmatprep.subr.bf16.mxu0 %v3128_v1 }
 0x4a4   :  { %v708_v60 = vpop.f32.mrb[16].mxu0 }
 0x4a5   :  { %v2777_v61 = vpop.f32.mrb[17].mxu0 }
 0x4a6   :  { %v711_v62 = vpop.f32.mrb[18].mxu0 }
 0x4a7   :  { %v2778_v63 = vpop.f32.mrb[19].mxu0 }
 0x4ac   :  { %v818_v0 = vpop.f32.mrb[20].mxu0 }
 0x4ad   :  { %v2981_v5 = vpack.i.bf16 %v818_v0, %v362_v48  ;;  %v2789_v14 = vpop.f32.mrb[21].mxu0 }
 0x4ae   :  { %v821_v6 = vpop.f32.mrb[22].mxu0  ;;  %v2579_v14 = vld [vmem:[%s3867_s8] ss:$0 sm:$0xff] }
 0x4af   :  { %2982 = vrot.lane.b32.xlu1 %v2981_v5, %s3850_s26  ;;  %v2790_v7 = vpop.f32.mrb[23].mxu0 }
 0x4b4   :  { %v928_v9 = vpop.f32.mrb[24].mxu0 }
 0x4b5   :  { %v2986_v10 = vpack.i.bf16 %v928_v9, %v472_v52  ;;  %v2801_v11 = vpop.f32.mrb[25].mxu0 }
 0x4b6   :  { %v931_v12 = vpop.f32.mrb[26].mxu0 }
 0x4b7   :  { %2987 = vrot.lane.b32.xlu1 %v2986_v10, %s3849_s1  ;;  %v2802_v15 = vpop.f32.mrb[27].mxu0  ;;  %s3866_s1 = sld [smem:[#allocation6_spill]]  ;;  %v2580_v10 = vld [vmem:[%s3829_s7] ss:$0 sm:$0xff] }
 0x4bc   :  { %v1038_v16 = vpop.f32.mrb[28].mxu0 }
 0x4bd   :  { %v2991_v17 = vpack.i.bf16 %v1038_v16, %v582_v56  ;;  %v2813_v18 = vpop.f32.mrb[29].mxu0  ;;  %v3016_v56 = vld [vmem:[%s3832_s10 + $0x8] sm:$0xff]   ;;  %v3017_v57 = vld [vmem:[%s3866_s1] sm:$0xff]  }
 0x4be   :  { %v1041_v19 = vpop.f32.mrb[30].mxu0 }
 0x4bf   :  { %2992 = vrot.lane.b32.xlu0 %v2991_v17, %s3848_s5  ;;  %v2814_v20 = vpop.f32.mrb[31].mxu0  ;;  %v2585_v17 = vld [vmem:[%s3833_s11] ss:$0 sm:$0xff] }
 0x521   :  { %v2983_v21 = vpop.permute.xlu1 %2982 }
 0x522   :  { %v2985_v23 = vunpack.i.h.bf16 %v2983_v21  ;;  %v2984_v24 = vunpack.i.l.bf16 %v2983_v21 }
 0x524   :  { %v1056_v28 = vsel %vm150_vm2, %v708_v60, %v2985_v23  ;;  %v600_v29 = vsel %vm150_vm2, %v252_v13, %v2984_v24 }
 0x529   :  { %v2988_v22 = vpop.permute.xlu1 %2987 }
 0x52a   :  { %v2990_v25 = vunpack.i.h.bf16 %v2988_v22  ;;  %v2989_v26 = vunpack.i.l.bf16 %v2988_v22 }
 0x52c   :  { %v1057_v32 = vsel %vm601_vm4, %v1056_v28, %v2990_v25  ;;  %v602_v33 = vsel %vm601_vm4, %v600_v29, %v2989_v26  ;;  %v2581_v26 = vld [vmem:[%s3831_s9] ss:$0 sm:$0xff]  ;;  %s3868_s9 = smov 72  }
 0x531   :  { %v2993_v27 = vpop.permute.xlu0 %2992 }
 0x532   :  { %v2995_v30 = vunpack.i.h.bf16 %v2993_v27  ;;  %v2994_v31 = vunpack.i.l.bf16 %v2993_v27 }
 0x534   :  { %v1058_v34 = vsel %vm603_vm5, %v1057_v32, %v2995_v30  ;;  %v604_v35 = vsel %vm603_vm5, %v602_v33, %v2994_v31 }
 0x535   :  { %v1059_v36 = vpack.c.bf16 %v1058_v34, %v604_v35 }
 0x537   :  { %2820 = vmatmul.mubr.msk.bf16.vlgmr.msra.gmra.mrb[36].mxu1 %vm101_vm1, %v1059_v36 }
 0x538   :  { %2835 = vmatprep.mubr.msk.bf16.mxu1 %vm3129_vm0, %v3128_v1 }
 0x60a   :  { %v1120_v38 = vpop.f32.mrb[36].mxu1 }
 0x60b   :  { %v1121_v39 = vadd.f32 %v2575_v37, %v1120_v38  ;;  %v2821_v40 = vpop.f32.mrb[37].mxu1 }
 0x60c   :  { %v1123_v41 = vpop.f32.mrb[38].mxu1 }
 0x60d   :  { %v1124_v42 = vadd.f32 %v2575_v37, %v1123_v41  ;;  %v2822_v43 = vpop.f32.mrb[39].mxu1  ;;  %v1127_v44 = vadd.f32 %v1121_v39, %v3274_v3 }
 0x60f   :  { %v1129_v13 = vsel %vm101_vm1, %v1127_v44, 0.0  ;;  %v1128_v45 = vadd.f32 %v1124_v42, %v3279_v4  ;;  %v3015_v4 = vld [vmem:[%s3832_s10] sm:$0xff]  }
 0x610   :  { %1130 = vadd.xlane.f32.xlu1 %v1129_v13  ;;  %2832 = vmatpush3.bf16.msra.mxu1 %v3015_v4 }
 0x611   :  { %v1132_v46 = vsel %vm101_vm1, %v1128_v45, 0.0  ;;  %2833 = vmatprep.subr.bf16.mxu1 %v3128_v1 }
 0x612   :  { %1133 = vadd.xlane.f32.xlu0 %v1132_v46 }
 0x614   :  { %2834 = vmatpush3.bf16.msra.mxu1 %v3016_v56 }
 0x615   :  { %2845 = vmatprep.subr.bf16.mxu1 %v3128_v1 }
 0x617   :  { %2836 = vmatmul.mubr.msk.bf16.vlgmr.msra.gmra.mrb[40].mxu1 %vm101_vm1, %v3017_v57 }
 0x618   :  { %2847 = vmatprep.mubr.msk.bf16.mxu1 %vm3129_vm0, %v3128_v1 }
 0x69d   :  { %v1131_v47 = vpop.xlane.xlu1 %1130 }
 0x69e   :  { %v1136_v48 = vmul.f32 0.03125, %v1131_v47 }
 0x69f   :  { %v1134_v49 = vpop.xlane.xlu0 %1133 }
 0x6a0   :  { %v1138_v50 = vsub.f32 %v1127_v44, %v1136_v48  ;;  %v1137_v51 = vmul.f32 0.03125, %v1134_v49 }
 0x6a2   :  { %v1139_v52 = vsub.f32 %v1128_v45, %v1137_v51  ;;  %v1140_v53 = vmul.f32 %v1138_v50, %v1138_v50 }
 0x6a4   :  { %v1142_v54 = vsel %vm101_vm1, %v1140_v53, 0.0  ;;  %v1141_v55 = vmul.f32 %v1139_v52, %v1139_v52 }
 0x6a5   :  { %1143 = vadd.xlane.f32.xlu0 %v1142_v54 }
 0x6a6   :  { %v1145_v3 = vsel %vm101_vm1, %v1141_v55, 0.0 }
 0x6a7   :  { %1146 = vadd.xlane.f32.xlu1 %v1145_v3 }
 0x6ea   :  { %v1307_v18 = vpop.f32.mrb[40].mxu1 }
 0x6eb   :  { %v1308_v19 = vadd.f32 %v2585_v17, %v1307_v18  ;;  %v2837_v20 = vpop.f32.mrb[41].mxu1 }
 0x6ec   :  { %v1310_v21 = vpop.f32.mrb[42].mxu1 }
 0x6ed   :  { %v1311_v22 = vadd.f32 %v2585_v17, %v1310_v21  ;;  %v2838_v23 = vpop.f32.mrb[43].mxu1 }
 0x6ef   :  { %v3553_v24 = vpack.c.bf16 %v1311_v22, %v1308_v19 }
 0x6f1   :  { %1426 = vrot.lane.b32.xlu0 %v3553_v24, %s3130_s2  ;;  %v1320_v25 = vsel %vm150_vm2, %v3553_v24, 0  ;;  %v3577_v37 = vrot.slane %v3553_v24, 4 }
 0x6f3   :  { %v1775_v13 = vsel %vm150_vm2, %v3577_v37, 0 }
 0x732   :  { %v1144_v60 = vpop.xlane.xlu0 %1143 }
 0x733   :  { %v1148_v61 = vmul.f32 0.03125, %v1144_v60 }
 0x734   :  { %v1147_v62 = vpop.xlane.xlu1 %1146 }
 0x735   :  { %v1150_v63 = vadd.f32 1e-05, %v1148_v61  ;;  %v1149_v0 = vmul.f32 0.03125, %v1147_v62 }
 0x737   :  { %3060 = vrsqrt.f32 %v1150_v63  ;;  %v1151_v2 = vadd.f32 1e-05, %v1149_v0 }
 0x739   :  { %3062 = vrsqrt.f32 %v1151_v2 }
 0x741   :  { %v3061_v5 = vpop.eup %3060 }
 0x742   :  { %v1154_v6 = vmul.f32 %v3061_v5, %v1138_v50 }
 0x743   :  { %v3063_v7 = vpop.eup %3062 }
 0x744   :  { %v1163_v8 = vmul.f32 %v2579_v14, %v1154_v6  ;;  %v1155_v9 = vmul.f32 %v3063_v7, %v1139_v52 }
 0x746   :  { %v1164_v11 = vmul.f32 %v2579_v14, %v1155_v9  ;;  %v3541_v12 = vadd.f32 %v2580_v10, %v1163_v8 }
 0x748   :  { %v3543_v15 = vadd.f32 %v2580_v10, %v1164_v11 }
 0x74a   :  { %v1174_v16 = vpack.c.bf16 %v3543_v15, %v3541_v12 }
 0x74c   :  { %2828 = vmatmul.mubr.msk.bf16.vlgmr.msra.gmra.mrb[32].mxu0 %vm101_vm1, %v1174_v16 }
 0x74d   :  { %2841 = vmatprep.mubr.msk.bf16.mxu0 %vm3129_vm0, %v3128_v1  ;;  %2840 = vmatpush3.bf16.xpose.msra.mxu0 %v1320_v25 }
 0x74e   :  { %2851 = vmatprep.subr.bf16.mxu0 %v3128_v1 }
 0x763   :  { %v1427_v33 = vpop.permute.xlu0 %1426 }
 0x764   :  { %v1432_v35 = vsel %vm150_vm2, %v1427_v33, 0 }
 0x81f   :  { %v1235_v27 = vpop.f32.mrb[32].mxu0 }
 0x820   :  { %v2829_v28 = vpop.f32.mrb[33].mxu0  ;;  %v1236_v30 = vadd.f32 %v2581_v26, %v1235_v27 }
 0x821   :  { %v1238_v29 = vpop.f32.mrb[34].mxu0 }
 0x822   :  { %v1239_v31 = vadd.f32 %v2581_v26, %v1238_v29  ;;  %v2830_v32 = vpop.f32.mrb[35].mxu0 }
 0x824   :  { %v1314_v34 = vpack.c.bf16 %v1239_v31, %v1236_v30 }
 0x826   :  { %1424 = vrot.lane.b32.xlu1 %v1314_v34, %s3130_s2  ;;  %1534 = vrot.lane.b32.xlu0 %v1314_v34, %s3135_s30  ;;  %v1769_v36 = vrot.slane %v1314_v34, 4 }
 0x827   :  { %2842 = vmatmul.mubr.msk.bf16.vlgmr.msra.gmra.mrb[36].mxu0 %vm150_vm2, %v1314_v34 }
 0x828   :  { %2852 = vmatpush3.bf16.xpose.msra.mxu0 %v1432_v35  ;;  %2853 = vmatprep.mubr.msk.bf16.mxu0 %vm3129_vm0, %v3128_v1 }
 0x829   :  { %2863 = vmatprep.subr.bf16.mxu0 %v3128_v1 }
 0x82a   :  { %1536 = vrot.lane.b32.xlu1 %v3553_v24, %s3135_s30  ;;  %1644 = vrot.lane.b32.xlu0 %v1314_v34, %s3136_s4 }
 0x82e   :  { %1646 = vrot.lane.b32.xlu1 %v3553_v24, %s3136_s4  ;;  %1877 = vrot.lane.b32.xlu0 %v1769_v36, %s3130_s2 }
 0x832   :  { %1987 = vrot.lane.b32.xlu0 %v1769_v36, %s3135_s30  ;;  %1879 = vrot.lane.b32.xlu1 %v3577_v37, %s3130_s2 }
 0x836   :  { %2097 = vrot.lane.b32.xlu0 %v1769_v36, %s3136_s4  ;;  %1989 = vrot.lane.b32.xlu1 %v3577_v37, %s3135_s30  ;;  %s3870_s30 = smov 16  }
 0x83a   :  { %2099 = vrot.lane.b32.xlu1 %v3577_v37, %s3136_s4  ;;  %s3871_s4 = smov 24  }
 0x898   :  { %v1425_v38 = vpop.permute.xlu1 %1424  ;;  %v1535_v42 = vpop.permute.xlu0 %1534 }
 0x899   :  { %2854 = vmatmul.mubr.msk.bf16.vlgmr.msra.gmra.mrb[40].mxu0 %vm150_vm2, %v1425_v38 }
 0x89a   :  { %2865 = vmatprep.mubr.msk.bf16.mxu0 %vm3129_vm0, %v3128_v1 }
 0x89c   :  { %v1537_v39 = vpop.permute.xlu1 %1536  ;;  %v1645_v44 = vpop.permute.xlu0 %1644 }
 0x89d   :  { %v1542_v40 = vsel %vm150_vm2, %v1537_v39, 0 }
 0x89e   :  { %2864 = vmatpush3.bf16.xpose.msra.mxu0 %v1542_v40 }
 0x89f   :  { %2875 = vmatprep.subr.bf16.mxu0 %v3128_v1 }
 0x8a0   :  { %v1647_v41 = vpop.permute.xlu1 %1646  ;;  %v1878_v48 = vpop.permute.xlu0 %1877 }
 0x8a1   :  { %v1652_v43 = vsel %vm150_vm2, %v1647_v41, 0 }
 0x8a4   :  { %v1880_v45 = vpop.permute.xlu1 %1879  ;;  %v1988_v51 = vpop.permute.xlu0 %1987 }
 0x8a5   :  { %2866 = vmatmul.mubr.msk.bf16.vlgmr.msra.gmra.mrb[44].mxu0 %vm150_vm2, %v1535_v42  ;;  %v1885_v46 = vsel %vm150_vm2, %v1880_v45, 0 }
 0x8a6   :  { %2876 = vmatpush3.bf16.xpose.msra.mxu0 %v1652_v43  ;;  %2877 = vmatprep.mubr.msk.bf16.mxu0 %vm3129_vm0, %v3128_v1 }
 0x8a7   :  { %2887 = vmatprep.subr.bf16.mxu0 %v3128_v1 }
 0x8a8   :  { %v1990_v47 = vpop.permute.xlu1 %1989  ;;  %v2098_v53 = vpop.permute.xlu0 %2097 }
 0x8a9   :  { %v1995_v49 = vsel %vm150_vm2, %v1990_v47, 0 }
 0x8ac   :  { %v2100_v50 = vpop.permute.xlu1 %2099 }
 0x8ad   :  { %2878 = vmatmul.mubr.msk.bf16.vlgmr.msra.gmra.mrb[48].mxu0 %vm150_vm2, %v1645_v44  ;;  %v2105_v52 = vsel %vm150_vm2, %v2100_v50, 0 }
 0x8ae   :  { %2888 = vmatpush3.bf16.xpose.msra.mxu0 %v1775_v13  ;;  %2889 = vmatprep.mubr.msk.bf16.mxu0 %vm3129_vm0, %v3128_v1 }
 0x8af   :  { %2899 = vmatprep.subr.bf16.mxu0 %v3128_v1 }
 0x8b5   :  { %2890 = vmatmul.mubr.msk.bf16.vlgmr.msra.gmra.mrb[52].mxu0 %vm150_vm2, %v1769_v36 }
 0x8b6   :  { %2900 = vmatpush3.bf16.xpose.msra.mxu0 %v1885_v46  ;;  %2901 = vmatprep.mubr.msk.bf16.mxu0 %vm3129_vm0, %v3128_v1 }
 0x8b7   :  { %2911 = vmatprep.subr.bf16.mxu0 %v3128_v1 }
 0x8bd   :  { %2902 = vmatmul.mubr.msk.bf16.vlgmr.msra.gmra.mrb[56].mxu0 %vm150_vm2, %v1878_v48 }
 0x8be   :  { %2912 = vmatpush3.bf16.xpose.msra.mxu0 %v1995_v49  ;;  %2913 = vmatprep.mubr.msk.bf16.mxu0 %vm3129_vm0, %v3128_v1 }
 0x8bf   :  { %2923 = vmatprep.subr.bf16.mxu0 %v3128_v1 }
 0x8c5   :  { %2914 = vmatmul.mubr.msk.bf16.vlgmr.msra.gmra.mrb[60].mxu0 %vm150_vm2, %v1988_v51 }
 0x8c6   :  { %2924 = vmatpush3.bf16.xpose.msra.mxu0 %v2105_v52  ;;  %2925 = vmatprep.mubr.msk.bf16.mxu0 %vm3129_vm0, %v3128_v1 }
 0x8c7   :  { %2935 = vmatprep.subr.bf16.mxu0 %v3128_v1 }
 0x8cd   :  { %2926 = vmatmul.mubr.msk.bf16.vlgmr.msra.gmra.mrb[64].mxu0 %vm150_vm2, %v2098_v53 }
 0x8ce   :  { %2939 = vmatprep.mubr.msk.bf16.mxu0 %vm3129_vm0, %v3128_v1 }
 0x8fa   :  { %v1356_v54 = vpop.f32.mrb[36].mxu0 }
 0x8fb   :  { %v2843_v55 = vpop.f32.mrb[37].mxu0  ;;  %v1362_v3 = vsel %vm150_vm2, %v1356_v54, -inf }
 0x8fc   :  { %1363 = vmax.xlane.f32.xlu1 %v1362_v3  ;;  %v1359_v4 = vpop.f32.mrb[38].mxu0 }
 0x8fd   :  { %v2844_v56 = vpop.f32.mrb[39].mxu0 }
 0x96c   :  { %v1468_v57 = vpop.f32.mrb[40].mxu0 }
 0x96d   :  { %v2855_v58 = vpop.f32.mrb[41].mxu0  ;;  %v1474_v59 = vsel %vm150_vm2, %v1468_v57, -inf }
 0x96e   :  { %1475 = vmax.xlane.f32.xlu0 %v1474_v59  ;;  %v1471_v60 = vpop.f32.mrb[42].mxu0 }
 0x96f   :  { %v2856_v61 = vpop.f32.mrb[43].mxu0 }
 0x978   :  { %v1578_v62 = vpop.f32.mrb[44].mxu0 }
 0x979   :  { %v2867_v63 = vpop.f32.mrb[45].mxu0  ;;  %v1584_v0 = vsel %vm150_vm2, %v1578_v62, -inf }
 0x97a   :  { %1585 = vmax.xlane.f32.xlu0 %v1584_v0  ;;  %v1581_v2 = vpop.f32.mrb[46].mxu0 }
 0x97b   :  { %v2868_v5 = vpop.f32.mrb[47].mxu0 }
 0x980   :  { %v1688_v14 = vpop.f32.mrb[48].mxu0 }
 0x981   :  { %v2879_v6 = vpop.f32.mrb[49].mxu0  ;;  %v1694_v7 = vsel %vm150_vm2, %v1688_v14, -inf }
 0x982   :  { %1695 = vmax.xlane.f32.xlu1 %v1694_v7  ;;  %v1691_v8 = vpop.f32.mrb[50].mxu0 }
 0x983   :  { %v2880_v9 = vpop.f32.mrb[51].mxu0 }
 0x988   :  { %v1811_v10 = vpop.f32.mrb[52].mxu0 }
 0x989   :  { %v2891_v11 = vpop.f32.mrb[53].mxu0  ;;  %v1817_v16 = vsel %vm150_vm2, %v1811_v10, -inf  ;;  %v1364_v34 = vpop.xlane.xlu1 %1363 }
 0x98a   :  { %1818 = vmax.xlane.f32.xlu0 %v1817_v16  ;;  %v1814_v17 = vpop.f32.mrb[54].mxu0  ;;  %v1365_v35 = vsub.f32 %v1356_v54, %v1364_v34 }
 0x98b   :  { %v2892_v18 = vpop.f32.mrb[55].mxu0 }
 0x98c   :  { %v1366_v36 = vmul.f32 1.442695, %v1365_v35 }
 0x98e   :  { %3064 = vpow2.f32 %v1366_v36 }
 0x990   :  { %v3626_v19 = vpop.f32.mrb[56].mxu0 }
 0x991   :  { %v2903_v20 = vpop.f32.mrb[57].mxu0  ;;  %v1927_v21 = vsel %vm150_vm2, %v3626_v19, -inf }
 0x992   :  { %1928 = vmax.xlane.f32.xlu1 %v1927_v21  ;;  %v1924_v22 = vpop.f32.mrb[58].mxu0 }
 0x993   :  { %v2904_v23 = vpop.f32.mrb[59].mxu0 }
 0x998   :  { %v2031_v25 = vpop.f32.mrb[60].mxu0  ;;  %v3639_v39 = vpop.eup %3064 }
 0x999   :  { %v2915_v26 = vpop.f32.mrb[61].mxu0  ;;  %v2037_v27 = vsel %vm150_vm2, %v2031_v25, -inf  ;;  %v1368_v40 = vsel %vm150_vm2, %v3639_v39, 0.0 }
 0x99a   :  { %2038 = vmax.xlane.f32.xlu0 %v2037_v27  ;;  %v2034_v28 = vpop.f32.mrb[62].mxu0 }
 0x99b   :  { %v2916_v29 = vpop.f32.mrb[63].mxu0 }
 0x9a0   :  { %v3631_v30 = vpop.f32.mrb[64].mxu0 }
 0x9a1   :  { %v2927_v31 = vpop.f32.mrb[65].mxu0  ;;  %v2147_v38 = vsel %vm150_vm2, %v3631_v30, -inf }
 0x9a2   :  { %v2144_v32 = vpop.f32.mrb[66].mxu0 }
 0x9a3   :  { %1486 = vrot.lane.b32.xlu1 %v3553_v24, %s3133_s28  ;;  %v2928_v33 = vpop.f32.mrb[67].mxu0 }
 0x9b0   :  { %1375 = vrot.lane.b32.xlu0 %v3553_v24, %s3131_s27 }
 0x9c7   :  { %2148 = vmax.xlane.f32.xlu1 %v2147_v38 }
 0x9cf   :  { %1369 = vadd.xlane.f32.xlu0 %v1368_v40 }
 0x9d8   :  { %1596 = vrot.lane.b32.xlu1 %v3553_v24, %s3132_s3 }
 0x9fb   :  { %v1476_v41 = vpop.xlane.xlu0 %1475 }
 0x9fc   :  { %v1477_v42 = vsub.f32 %v1468_v57, %v1476_v41 }
 0x9fe   :  { %v1478_v43 = vmul.f32 1.442695, %v1477_v42 }
 0xa00   :  { %3066 = vpow2.f32 %v1478_v43 }
 0xa07   :  { %v1586_v44 = vpop.xlane.xlu0 %1585 }
 0xa08   :  { %v1587_v13 = vsub.f32 %v1578_v62, %v1586_v44 }
 0xa0a   :  { %v3645_v45 = vpop.eup %3066  ;;  %v1588_v46 = vmul.f32 1.442695, %v1587_v13 }
 0xa0b   :  { %v1480_v47 = vsel %vm150_vm2, %v3645_v45, 0.0 }
 0xa0c   :  { %3068 = vpow2.f32 %v1588_v46  ;;  %1481 = vadd.xlane.f32.xlu1 %v1480_v47 }
 0xa0f   :  { %v1696_v48 = vpop.xlane.xlu1 %1695 }
 0xa10   :  { %v1697_v49 = vsub.f32 %v1688_v14, %v1696_v48 }
 0xa12   :  { %v1698_v50 = vmul.f32 1.442695, %v1697_v49 }
 0xa14   :  { %3070 = vpow2.f32 %v1698_v50 }
 0xa16   :  { %v3649_v51 = vpop.eup %3068 }
 0xa17   :  { %v1819_v52 = vpop.xlane.xlu0 %1818  ;;  %v1590_v53 = vsel %vm150_vm2, %v3649_v51, 0.0 }
 0xa18   :  { %v1820_v54 = vsub.f32 %v1811_v10, %v1819_v52  ;;  %1591 = vadd.xlane.f32.xlu0 %v1590_v53 }
 0xa1a   :  { %v1821_v55 = vmul.f32 1.442695, %v1820_v54 }
 0xa1c   :  { %3072 = vpow2.f32 %v1821_v55 }
 0xa1e   :  { %v3653_v3 = vpop.eup %3070 }
 0xa1f   :  { %v1700_v4 = vsel %vm150_vm2, %v3653_v3, 0.0  ;;  %v1929_v63 = vpop.xlane.xlu1 %1928 }
 0xa20   :  { %1701 = vadd.xlane.f32.xlu1 %v1700_v4  ;;  %v1930_v2 = vsub.f32 %v3626_v19, %v1929_v63 }
 0xa22   :  { %v1931_v14 = vmul.f32 1.442695, %v1930_v2 }
 0xa26   :  { %v3657_v56 = vpop.eup %3072 }
 0xa27   :  { %v2039_v57 = vpop.xlane.xlu0 %2038  ;;  %v1823_v58 = vsel %vm150_vm2, %v3657_v56, 0.0 }
 0xa28   :  { %v2040_v59 = vsub.f32 %v2031_v25, %v2039_v57  ;;  %1824 = vadd.xlane.f32.xlu1 %v1823_v58 }
 0xa2a   :  { %v2041_v60 = vmul.f32 1.442695, %v2040_v59 }
 0xa2b   :  { %v1376_v61 = vpop.permute.xlu0 %1375 }
 0xa2c   :  { %3074 = vpow2.f32 %v2041_v60  ;;  %v1381_v62 = vsel %vm214_vm3, %v1376_v61, 0 }
 0xa2d   :  { %2846 = vmatpush3.bf16.msra.mxu1 %v1381_v62  ;;  %3076 = vpow2.f32 %v1931_v14 }
 0xa2e   :  { %1706 = vrot.lane.b32.xlu0 %v3553_v24, %s3868_s9  ;;  %2857 = vmatprep.subr.bf16.mxu1 %v3128_v1  ;;  %v1487_v24 = vpop.permute.xlu1 %1486 }
 0xa2f   :  { %v1492_v21 = vsel %vm214_vm3, %v1487_v24, 0 }
 0xa36   :  { %v3665_v0 = vpop.eup %3074 }
 0xa37   :  { %v2043_v5 = vsel %vm150_vm2, %v3665_v0, 0.0  ;;  %v3670_v6 = vpop.eup %3076 }
 0xa38   :  { %2044 = vadd.xlane.f32.xlu1 %v2043_v5  ;;  %v1933_v7 = vsel %vm150_vm2, %v3670_v6, 0.0 }
 0xa4d   :  { %1934 = vadd.xlane.f32.xlu0 %v1933_v7 }
 0xa54   :  { %v2149_v8 = vpop.xlane.xlu1 %2148 }
 0xa55   :  { %v2150_v9 = vsub.f32 %v3631_v30, %v2149_v8 }
 0xa57   :  { %v2151_v10 = vmul.f32 1.442695, %v2150_v9 }
 0xa58   :  { %v1597_v22 = vpop.permute.xlu1 %1596 }
 0xa59   :  { %3078 = vpow2.f32 %v2151_v10  ;;  %v1602_v29 = vsel %vm214_vm3, %v1597_v22, 0  ;;  %v3020_v22 = vld [vmem:[%s3834_s12] sm:$0xff]  }
 0xa5a   :  { %2936 = vmatpush3.bf16.msra.mxu0 %v3020_v22 }
 0xa5b   :  { %2937 = vmatprep.subr.bf16.mxu0 %v3128_v1 }
 0xa5c   :  { %v1370_v11 = vpop.xlane.xlu0 %1369 }
 0xa5d   :  { %3080 = vrcp.f32 %v1370_v11 }
 0xa63   :  { %v3675_v16 = vpop.eup %3078  ;;  %1939 = vrot.lane.b32.xlu0 %v3577_v37, %s3133_s28 }
 0xa64   :  { %v2153_v17 = vsel %vm150_vm2, %v3675_v16, 0.0 }
 0xa65   :  { %2154 = vadd.xlane.f32.xlu1 %v2153_v17 }
 0xa67   :  { %v3081_v18 = vpop.eup %3080  ;;  %2049 = vrot.lane.b32.xlu0 %v3577_v37, %s3132_s3 }
 0xa68   :  { %v1372_v19 = vmul.f32 %v3081_v18, %v3639_v39 }
 0xa6a   :  { %v1373_v20 = vpack.c.bf16 %v1372_v19, %v1372_v19 }
 0xa6b   :  { %2159 = vrot.lane.b32.xlu0 %v3577_v37, %s3868_s9 }
 0xa6c   :  { %2848 = vmatmul.mubr.msk.bf16.vlgmr.msra.gmra.mrb[44].mxu1 %vm150_vm2, %v1373_v20 }
 0xa6d   :  { %2858 = vmatpush3.bf16.msra.mxu1 %v1492_v21  ;;  %2859 = vmatprep.mubr.msk.bf16.mxu1 %vm3129_vm0, %v3128_v1 }
 0xa6e   :  { %2869 = vmatprep.subr.bf16.mxu1 %v3128_v1 }
 0xa76   :  { %1829 = vrot.lane.b32.xlu1 %v3577_v37, %s3131_s27  ;;  %s3869_s27 = smov 8  }
 0xa99   :  { %v1482_v23 = vpop.xlane.xlu1 %1481 }
 0xa9a   :  { %3082 = vrcp.f32 %v1482_v23 }
 0xaa4   :  { %v3083_v25 = vpop.eup %3082 }
 0xaa5   :  { %v1484_v26 = vmul.f32 %v3083_v25, %v3645_v45  ;;  %v1592_v27 = vpop.xlane.xlu0 %1591 }
 0xaa6   :  { %3084 = vrcp.f32 %v1592_v27 }
 0xaa7   :  { %v1485_v28 = vpack.c.bf16 %v1484_v26, %v1484_v26 }
 0xaa9   :  { %2860 = vmatmul.mubr.msk.bf16.vlgmr.msra.gmra.mrb[48].mxu1 %vm150_vm2, %v1485_v28  ;;  %v1707_v32 = vpop.permute.xlu0 %1706  ;;  %v3021_v28 = vld [vmem:[%s3834_s12 + $0x8] sm:$0xff]  }
 0xaaa   :  { %2870 = vmatpush3.bf16.msra.mxu1 %v1602_v29  ;;  %2871 = vmatprep.mubr.msk.bf16.mxu1 %vm3129_vm0, %v3128_v1  ;;  %v1712_v34 = vsel %vm214_vm3, %v1707_v32, 0 }
 0xaab   :  { %2881 = vmatprep.subr.bf16.mxu1 %v3128_v1  ;;  %2938 = vmatpush3.bf16.msra.mxu0 %v3021_v28 }
 0xaac   :  { %2951 = vmatprep.subr.bf16.mxu0 %v3128_v1 }
 0xaad   :  { %v1702_v37 = vpop.xlane.xlu1 %1701 }
 0xaae   :  { %3086 = vrcp.f32 %v1702_v37 }
 0xab0   :  { %v3085_v30 = vpop.eup %3084 }
 0xab1   :  { %v1594_v31 = vmul.f32 %v3085_v30, %v3649_v51 }
 0xab3   :  { %v1595_v33 = vpack.c.bf16 %v1594_v31, %v1594_v31 }
 0xab5   :  { %2872 = vmatmul.mubr.msk.bf16.vlgmr.msra.gmra.mrb[52].mxu1 %vm150_vm2, %v1595_v33  ;;  %v1825_v39 = vpop.xlane.xlu1 %1824 }
 0xab6   :  { %2882 = vmatpush3.bf16.msra.mxu1 %v1712_v34  ;;  %2883 = vmatprep.mubr.msk.bf16.mxu1 %vm3129_vm0, %v3128_v1  ;;  %3088 = vrcp.f32 %v1825_v39 }
 0xab7   :  { %2893 = vmatprep.subr.bf16.mxu1 %v3128_v1 }
 0xab8   :  { %v3087_v35 = vpop.eup %3086 }
 0xab9   :  { %v1704_v36 = vmul.f32 %v3087_v35, %v3653_v3 }
 0xabb   :  { %v1705_v38 = vpack.c.bf16 %v1704_v36, %v1704_v36 }
 0xabd   :  { %2884 = vmatmul.mubr.msk.bf16.vlgmr.msra.gmra.mrb[56].mxu1 %vm150_vm2, %v1705_v38 }
 0xabe   :  { %2895 = vmatprep.mubr.msk.bf16.mxu1 %vm3129_vm0, %v3128_v1 }
 0xac0   :  { %v3089_v42 = vpop.eup %3088 }
 0xac1   :  { %v1827_v44 = vmul.f32 %v3089_v42, %v3657_v56 }
 0xac3   :  { %v1828_v47 = vpack.c.bf16 %v1827_v44, %v1827_v44 }
 0xac5   :  { %v2045_v41 = vpop.xlane.xlu1 %2044 }
 0xada   :  { %v1935_v40 = vpop.xlane.xlu0 %1934 }
 0xadb   :  { %3090 = vrcp.f32 %v1935_v40 }
 0xadc   :  { %3092 = vrcp.f32 %v2045_v41 }
 0xade   :  { %v1940_v46 = vpop.permute.xlu0 %1939 }
 0xadf   :  { %v1945_v49 = vsel %vm214_vm3, %v1940_v46, 0 }
 0xae2   :  { %v2050_v51 = vpop.permute.xlu0 %2049 }
 0xae3   :  { %v2055_v54 = vsel %vm214_vm3, %v2050_v51, 0 }
 0xae5   :  { %v3091_v48 = vpop.eup %3090 }
 0xae6   :  { %v1937_v50 = vmul.f32 %v3091_v48, %v3670_v6  ;;  %v3093_v53 = vpop.eup %3092  ;;  %v2160_v3 = vpop.permute.xlu0 %2159 }
 0xae7   :  { %v2047_v55 = vmul.f32 %v3093_v53, %v3665_v0  ;;  %v2165_v57 = vsel %vm214_vm3, %v2160_v3, 0 }
 0xae8   :  { %v1938_v52 = vpack.c.bf16 %v1937_v50, %v1937_v50 }
 0xae9   :  { %v2048_v4 = vpack.c.bf16 %v2047_v55, %v2047_v55 }
 0xaf2   :  { %v2155_v43 = vpop.xlane.xlu1 %2154 }
 0xaf3   :  { %3094 = vrcp.f32 %v2155_v43 }
 0xaf6   :  { %v1830_v13 = vpop.permute.xlu1 %1829 }
 0xaf7   :  { %v1835_v45 = vsel %vm214_vm3, %v1830_v13, 0 }
 0xaf8   :  { %2894 = vmatpush3.bf16.msra.mxu1 %v1835_v45 }
 0xaf9   :  { %2905 = vmatprep.subr.bf16.mxu1 %v3128_v1 }
 0xafb   :  { %2896 = vmatmul.mubr.msk.bf16.vlgmr.msra.gmra.mrb[60].mxu1 %vm150_vm2, %v1828_v47 }
 0xafc   :  { %2906 = vmatpush3.bf16.msra.mxu1 %v1945_v49  ;;  %2907 = vmatprep.mubr.msk.bf16.mxu1 %vm3129_vm0, %v3128_v1 }
 0xafd   :  { %2917 = vmatprep.subr.bf16.mxu1 %v3128_v1  ;;  %v3095_v56 = vpop.eup %3094 }
 0xafe   :  { %v2157_v58 = vmul.f32 %v3095_v56, %v3675_v16 }
 0xb00   :  { %v2158_v59 = vpack.c.bf16 %v2157_v58, %v2157_v58 }
 0xb03   :  { %2908 = vmatmul.mubr.msk.bf16.vlgmr.msra.gmra.mrb[64].mxu1 %vm150_vm2, %v1938_v52 }
 0xb04   :  { %2918 = vmatpush3.bf16.msra.mxu1 %v2055_v54  ;;  %2919 = vmatprep.mubr.msk.bf16.mxu1 %vm3129_vm0, %v3128_v1  ;;  %v2606_v54 = vld [vmem:[%s3835_s13] ss:$0 sm:$0xff] }
 0xb05   :  { %2929 = vmatprep.subr.bf16.mxu1 %v3128_v1 }
 0xb0b   :  { %2920 = vmatmul.mubr.msk.bf16.vlgmr.msra.gmra.mrb[68].mxu1 %vm150_vm2, %v2048_v4 }
 0xb0c   :  { %2930 = vmatpush3.bf16.msra.mxu1 %v2165_v57  ;;  %2931 = vmatprep.mubr.msk.bf16.mxu1 %vm3129_vm0, %v3128_v1 }
 0xb0d   :  { %2943 = vmatprep.subr.bf16.mxu1 %v3128_v1 }
 0xb13   :  { %2932 = vmatmul.mubr.msk.bf16.vlgmr.msra.gmra.mrb[72].mxu1 %vm150_vm2, %v2158_v59 }
 0xb14   :  { %2947 = vmatprep.mubr.msk.bf16.mxu1 %vm3129_vm0, %v3128_v1 }
 0xb3f   :  { %v1417_v60 = vpop.f32.mrb[44].mxu1 }
 0xb40   :  { %v2849_v61 = vpop.f32.mrb[45].mxu1 }
 0xb41   :  { %v1420_v62 = vpop.f32.mrb[46].mxu1 }
 0xb42   :  { %v2850_v63 = vpop.f32.mrb[47].mxu1 }
 0xb7c   :  { %v1528_v0 = vpop.f32.mrb[48].mxu1 }
 0xb7d   :  { %v2861_v2 = vpop.f32.mrb[49].mxu1 }
 0xb7e   :  { %v1531_v5 = vpop.f32.mrb[50].mxu1 }
 0xb7f   :  { %v2862_v14 = vpop.f32.mrb[51].mxu1 }
 0xb88   :  { %v1638_v6 = vpop.f32.mrb[52].mxu1 }
 0xb89   :  { %v2873_v7 = vpop.f32.mrb[53].mxu1 }
 0xb8a   :  { %v1641_v24 = vpop.f32.mrb[54].mxu1 }
 0xb8b   :  { %v2874_v8 = vpop.f32.mrb[55].mxu1 }
 0xb90   :  { %v1748_v9 = vpop.f32.mrb[56].mxu1 }
 0xb91   :  { %v2885_v10 = vpop.f32.mrb[57].mxu1 }
 0xb92   :  { %v1751_v11 = vpop.f32.mrb[58].mxu1  ;;  %v3024_v10 = vld [vmem:[%s3840_s18] sm:$0xff]  }
 0xb93   :  { %v2886_v16 = vpop.f32.mrb[59].mxu1  ;;  %v3025_v11 = vld [vmem:[%s3840_s18 + $0x8] sm:$0xff]  }
 0xbce   :  { %v1871_v17 = vpop.f32.mrb[60].mxu1 }
 0xbcf   :  { %v2897_v18 = vpop.f32.mrb[61].mxu1 }
 0xbd0   :  { %v1874_v19 = vpop.f32.mrb[62].mxu1 }
 0xbd1   :  { %v2898_v20 = vpop.f32.mrb[63].mxu1 }
 0xbd6   :  { %v1981_v21 = vpop.f32.mrb[64].mxu1 }
 0xbd7   :  { %v2996_v23 = vpack.i.bf16 %v1981_v21, %v1528_v0  ;;  %v2909_v25 = vpop.f32.mrb[65].mxu1 }
 0xbd8   :  { %v1984_v26 = vpop.f32.mrb[66].mxu1  ;;  %v2610_v25 = vld [vmem:[%s3836_s14] ss:$0 sm:$0xff] }
 0xbd9   :  { %2997 = vrot.lane.b32.xlu1 %v2996_v23, %s3869_s27  ;;  %v2910_v27 = vpop.f32.mrb[67].mxu1 }
 0xbde   :  { %v2091_v29 = vpop.f32.mrb[68].mxu1 }
 0xbdf   :  { %v3001_v37 = vpack.i.bf16 %v2091_v29, %v1638_v6  ;;  %v2921_v30 = vpop.f32.mrb[69].mxu1  ;;  %v2611_v29 = vld [vmem:[%s3837_s15] ss:$0 sm:$0xff] }
 0xbe0   :  { %v2094_v31 = vpop.f32.mrb[70].mxu1 }
 0xbe1   :  { %3002 = vrot.lane.b32.xlu0 %v3001_v37, %s3870_s30  ;;  %v2922_v32 = vpop.f32.mrb[71].mxu1 }
 0xbe6   :  { %v2201_v33 = vpop.f32.mrb[72].mxu1 }
 0xbe7   :  { %v3006_v34 = vpack.i.bf16 %v2201_v33, %v1748_v9  ;;  %v2933_v35 = vpop.f32.mrb[73].mxu1  ;;  %v3023_v9 = vld [vmem:[%s3838_s16 + $0x8] sm:$0xff]   ;;  %v3026_v33 = vld [vmem:[%s3840_s18 + $0x10] sm:$0xff]  }
 0xbe8   :  { %v2204_v36 = vpop.f32.mrb[74].mxu1  ;;  %v2612_v35 = vld [vmem:[%s3839_s17] ss:$0 sm:$0xff] }
 0xbe9   :  { %3007 = vrot.lane.b32.xlu1 %v3006_v34, %s3871_s4  ;;  %v2934_v38 = vpop.f32.mrb[75].mxu1  ;;  %v3027_v34 = vld [vmem:[%s3840_s18 + $0x18] sm:$0xff]   ;;  %s3144_s4 = smov [#allocation2]  }
 0xbea   :  { %s2544_s12 = sshll.u32 %s3144_s4, 4  ;;  %s2545_s12 = int_to_ptr.vmem [resolvable:$true] %s2544_s12 }
 0xbeb   :  { %s3104_s25 = scalar_lea.vmem %s2545_s12, 256  ;;  %p3109_p1 = scmp.lt.s32.totalorder %s2545_s12, %s2545_s12 }
 0xbec   :  { %p3105_p0 = scmp.ne.s32.totalorder %s2545_s12, %s3104_s25  ;;  %p3110_p2 = scmp.lt.s32.totalorder %s3104_s25, %s3104_s25 }
 0xbee   :  { %p3111_p3 = por %p3110_p2, %p3109_p1 }
 0xbf0   :  { %p3112_p4 = pnand %p3111_p3, %p3105_p0 }
 0xc4b   :  { %v2998_v39 = vpop.permute.xlu1 %2997 }
 0xc4c   :  { %v3000_v41 = vunpack.i.h.bf16 %v2998_v39  ;;  %v2999_v42 = vunpack.i.l.bf16 %v2998_v39 }
 0xc4e   :  { %v2219_v45 = vsel %vm150_vm2, %v1871_v17, %v3000_v41  ;;  %v1766_v46 = vsel %vm150_vm2, %v1417_v60, %v2999_v42 }
 0xc53   :  { %v3003_v40 = vpop.permute.xlu0 %3002 }
 0xc54   :  { %v3005_v43 = vunpack.i.h.bf16 %v3003_v40  ;;  %v3004_v44 = vunpack.i.l.bf16 %v3003_v40 }
 0xc56   :  { %v2220_v49 = vsel %vm601_vm4, %v2219_v45, %v3005_v43  ;;  %v1767_v50 = vsel %vm601_vm4, %v1766_v46, %v3004_v44 }
 0xc5b   :  { %v3008_v13 = vpop.permute.xlu1 %3007 }
 0xc5c   :  { %v3010_v47 = vunpack.i.h.bf16 %v3008_v13  ;;  %v3009_v48 = vunpack.i.l.bf16 %v3008_v13 }
 0xc5e   :  { %v2221_v51 = vsel %vm603_vm5, %v2220_v49, %v3010_v47  ;;  %v1768_v52 = vsel %vm603_vm5, %v1767_v50, %v3009_v48 }
 0xc5f   :  { %v2222_v53 = vpack.c.bf16 %v2221_v51, %v1768_v52 }
 0xc61   :  { %2940 = vmatmul.mubr.msk.bf16.vlgmr.msra.gmra.mrb[68].mxu0 %vm101_vm1, %v2222_v53 }
 0xc62   :  { %2959 = vmatprep.mubr.msk.bf16.mxu0 %vm3129_vm0, %v3128_v1  ;;  %2952 = vmatpush3.bf16.msra.mxu0 %v3024_v10 }
 0xc63   :  { %2953 = vmatprep.subr.bf16.mxu0 %v3128_v1 }
 0xc66   :  { %2954 = vmatpush3.bf16.msra.mxu0 %v3025_v11 }
 0xc67   :  { %2955 = vmatprep.subr.bf16.mxu0 %v3128_v1 }
 0xc6a   :  { %2956 = vmatpush3.bf16.msra.mxu0 %v3026_v33 }
 0xc6b   :  { %2957 = vmatprep.subr.bf16.mxu0 %v3128_v1 }
 0xc6e   :  { %2958 = vmatpush3.bf16.msra.mxu0 %v3027_v34 }
 0xd34   :  { %v2283_v55 = vpop.f32.mrb[68].mxu0 }
 0xd35   :  { %v2284_v3 = vadd.f32 %v2606_v54, %v2283_v55  ;;  %v2941_v4 = vpop.f32.mrb[69].mxu0 }
 0xd36   :  { %v2286_v56 = vpop.f32.mrb[70].mxu0 }
 0xd37   :  { %v2287_v57 = vadd.f32 %v2606_v54, %v2286_v56  ;;  %v2942_v58 = vpop.f32.mrb[71].mxu0  ;;  %v2290_v59 = vadd.f32 %v2284_v3, %v3541_v12 }
 0xd39   :  { %v2292_v60 = vsel %vm101_vm1, %v2290_v59, 0.0  ;;  %v2291_v61 = vadd.f32 %v2287_v57, %v3543_v15  ;;  %v3022_v15 = vld [vmem:[%s3838_s16] sm:$0xff]  }
 0xd3a   :  { %2293 = vadd.xlane.f32.xlu0 %v2292_v60  ;;  %2944 = vmatpush3.bf16.msra.mxu1 %v3022_v15  ;;  %v2623_v15 = vld [vmem:[%s3843_s21] ss:$0 sm:$0xff] }
 0xd3b   :  { %v2295_v62 = vsel %vm101_vm1, %v2291_v61, 0.0  ;;  %2945 = vmatprep.subr.bf16.mxu1 %v3128_v1  ;;  %v2616_v1 = vld [vmem:[%s3841_s19] ss:$0 sm:$0xff] }
 0xd3c   :  { %2296 = vadd.xlane.f32.xlu1 %v2295_v62 }
 0xd3e   :  { %2946 = vmatpush3.bf16.msra.mxu1 %v3023_v9 }
 0xdc7   :  { %v2294_v63 = vpop.xlane.xlu0 %2293 }
 0xdc8   :  { %v2298_v0 = vmul.f32 0.03125, %v2294_v63 }
 0xdc9   :  { %v2297_v2 = vpop.xlane.xlu1 %2296 }
 0xdca   :  { %v2300_v5 = vsub.f32 %v2290_v59, %v2298_v0  ;;  %v2299_v14 = vmul.f32 0.03125, %v2297_v2 }
 0xdcc   :  { %v2301_v6 = vsub.f32 %v2291_v61, %v2299_v14  ;;  %v2302_v7 = vmul.f32 %v2300_v5, %v2300_v5 }
 0xdce   :  { %v2304_v24 = vsel %vm101_vm1, %v2302_v7, 0.0  ;;  %v2303_v8 = vmul.f32 %v2301_v6, %v2301_v6 }
 0xdcf   :  { %2305 = vadd.xlane.f32.xlu0 %v2304_v24  ;;  %v2622_v24 = vld [vmem:[%s3842_s20] ss:$0 sm:$0xff] }
 0xdd0   :  { %v2307_v12 = vsel %vm101_vm1, %v2303_v8, 0.0 }
 0xdd3   :  { %2308 = vadd.xlane.f32.xlu0 %v2307_v12 }
 0xe5c   :  { %v2306_v16 = vpop.xlane.xlu0 %2305 }
 0xe5d   :  { %v2310_v17 = vmul.f32 0.03125, %v2306_v16 }
 0xe5f   :  { %v2312_v18 = vadd.f32 1e-05, %v2310_v17 }
 0xe60   :  { %v2309_v19 = vpop.xlane.xlu0 %2308 }
 0xe61   :  { %3096 = vrsqrt.f32 %v2312_v18  ;;  %v2311_v20 = vmul.f32 0.03125, %v2309_v19 }
 0xe63   :  { %v2313_v21 = vadd.f32 1e-05, %v2311_v20 }
 0xe65   :  { %3098 = vrsqrt.f32 %v2313_v21 }
 0xe6b   :  { %v3097_v22 = vpop.eup %3096 }
 0xe6c   :  { %v2316_v23 = vmul.f32 %v3097_v22, %v2300_v5 }
 0xe6e   :  { %v2325_v27 = vmul.f32 %v2610_v25, %v2316_v23 }
 0xe6f   :  { %v3099_v26 = vpop.eup %3098 }
 0xe70   :  { %v2317_v28 = vmul.f32 %v3099_v26, %v2301_v6  ;;  %v2334_v30 = vadd.f32 %v2611_v29, %v2325_v27 }
 0xe72   :  { %v2326_v37 = vmul.f32 %v2610_v25, %v2317_v28 }
 0xe74   :  { %v2335_v31 = vadd.f32 %v2611_v29, %v2326_v37 }
 0xe76   :  { %v2336_v32 = vpack.c.bf16 %v2335_v31, %v2334_v30 }
 0xe78   :  { %2948 = vmatmul.mubr.msk.bf16.vlgmr.msra.gmra.mrb[76].mxu1 %vm101_vm1, %v2336_v32 }
 0xf4b   :  { %v2397_v36 = vpop.f32.mrb[76].mxu1 }
 0xf4c   :  { %v2398_v38 = vadd.f32 %v2612_v35, %v2397_v36  ;;  %v2949_v39 = vpop.f32.mrb[77].mxu1 }
 0xf4d   :  { %v2400_v40 = vpop.f32.mrb[78].mxu1 }
 0xf4e   :  { %v2401_v41 = vadd.f32 %v2612_v35, %v2400_v40  ;;  %v2950_v42 = vpop.f32.mrb[79].mxu1  ;;  %v2404_v43 = vmax.f32 %v2398_v38, 0.0 }
 0xf50   :  { %v2405_v44 = vmax.f32 %v2401_v41, 0.0 }
 0xf52   :  { %v2406_v13 = vpack.c.bf16 %v2405_v44, %v2404_v43 }
 0xf54   :  { %2960 = vmatmul.mubr.msk.bf16.vlgmr.msra.gmra.mrb[72].mxu0 %vm2446_vm6, %v2406_v13 }
0x1027   :  { %v2484_v45 = vpop.f32.mrb[72].mxu0 }
0x1028   :  { %v2485_v46 = vadd.f32 %v2616_v1, %v2484_v45  ;;  %v2961_v47 = vpop.f32.mrb[73].mxu0 }
0x1029   :  { %v2487_v48 = vpop.f32.mrb[74].mxu0 }
0x102a   :  { %v2488_v49 = vadd.f32 %v2616_v1, %v2487_v48  ;;  %v2962_v50 = vpop.f32.mrb[75].mxu0  ;;  %v2491_v51 = vadd.f32 %v2485_v46, %v2334_v30 }
0x102c   :  { %v2493_v52 = vsel %vm101_vm1, %v2491_v51, 0.0  ;;  %v2492_v53 = vadd.f32 %v2488_v49, %v2335_v31 }
0x102d   :  { %2494 = vadd.xlane.f32.xlu1 %v2493_v52 }
0x102e   :  { %v2496_v54 = vsel %vm101_vm1, %v2492_v53, 0.0 }
0x102f   :  { %2497 = vadd.xlane.f32.xlu0 %v2496_v54 }
0x10ba   :  { %v2495_v55 = vpop.xlane.xlu1 %2494 }
0x10bb   :  { %v2499_v3 = vmul.f32 0.03125, %v2495_v55 }
0x10bc   :  { %v2498_v4 = vpop.xlane.xlu0 %2497 }
0x10bd   :  { %v2501_v56 = vsub.f32 %v2491_v51, %v2499_v3  ;;  %v2500_v57 = vmul.f32 0.03125, %v2498_v4 }
0x10bf   :  { %v2502_v58 = vsub.f32 %v2492_v53, %v2500_v57  ;;  %v2503_v59 = vmul.f32 %v2501_v56, %v2501_v56 }
0x10c1   :  { %v2505_v60 = vsel %vm101_vm1, %v2503_v59, 0.0  ;;  %v2504_v61 = vmul.f32 %v2502_v58, %v2502_v58 }
0x10c2   :  { %2506 = vadd.xlane.f32.xlu1 %v2505_v60 }
0x10c3   :  { %v2508_v62 = vsel %vm101_vm1, %v2504_v61, 0.0 }
0x10c4   :  { %2509 = vadd.xlane.f32.xlu0 %v2508_v62 }
0x114f   :  { %v2507_v63 = vpop.xlane.xlu1 %2506 }
0x1150   :  { %v2511_v0 = vmul.f32 0.03125, %v2507_v63 }
0x1151   :  { %v2510_v2 = vpop.xlane.xlu0 %2509 }
0x1152   :  { %v2513_v5 = vadd.f32 1e-05, %v2511_v0  ;;  %v2512_v14 = vmul.f32 0.03125, %v2510_v2 }
0x1154   :  { %3100 = vrsqrt.f32 %v2513_v5  ;;  %v2514_v6 = vadd.f32 1e-05, %v2512_v14 }
0x1156   :  { %3102 = vrsqrt.f32 %v2514_v6 }
0x115e   :  { %v3101_v7 = vpop.eup %3100 }
0x115f   :  { %v2517_v8 = vmul.f32 %v3101_v7, %v2501_v56 }
0x1160   :  { %v3103_v12 = vpop.eup %3102 }
0x1161   :  { %v2518_v9 = vmul.f32 %v3103_v12, %v2502_v58  ;;  %v2526_v10 = vmul.f32 %v2622_v24, %v2517_v8 }
0x1163   :  { %v2527_v11 = vmul.f32 %v2622_v24, %v2518_v9  ;;  %v2535_v16 = vadd.f32 %v2623_v15, %v2526_v10 }
0x1165   :  { %v2536_v17 = vadd.f32 %v2623_v15, %v2527_v11  ;;  %2537 = vst.msk [vmem:[#allocation2] sm:$0xff] %vm101_vm1, %v2535_v16 }
0x1167   :  { %2538 = vst.msk [vmem:[#allocation2 + $0x8] sm:$0xff] %vm101_vm1, %v2536_v17 }
0x1168   :  { %3115 = shalt.err (!%p3112_p4)
}
0x1169   :  { %s3116_s13 = scalar_lea.hbm %s3844_s22, 256 }
0x116a   :  { %p3117_p5 = scmp.ne.s32.totalorder %s3844_s22, %s3116_s13  ;;  %p3120_p6 = scmp.lt.u32.totalorder %s3116_s13, %s3844_s22 }
0x116c   :  { %p3122_p7 = pnand %p3120_p6, %p3117_p5 }
0x116e   :  { %3125 = shalt.err (!%p3122_p7)
}
0x116f   :  { %s3145_s8 = smov 128  }
0x1170   :  { %2550 = dma.vmem_to_hbm [thread:$0]  %s2545_s12, 256, %s3844_s22, [#allocation3], %s3145_s8, %s3145_s8, %s3869_s27  }
0x1171   :  { %3126 = dma.done.wait [#allocation3], 256  }
0x1172   :  { %3127 = vsyncadd [#allocation3], 4294967040 }
0x1173   :  { %2554 = vsyncpa [#allocation3], 1 }

</bundles_post_ra>
